<compile_context>
chip_gen: v6e
topology: v6e:2x2x1
jax: 0.10.0
libtpu: 0.0.40
codegen_flags: <defaults>
</compile_context>

<pallas_src>
import functools
import math

import jax
import jax.numpy as jnp
from jax import lax
from jax.experimental import pallas as pl
from jax.experimental.pallas import tpu as pltpu

LN_EPS = 1e-5


def _layernorm(x, g, b):
    # Single-pass LayerNorm over last dim (biased variance, eps=1e-5).
    # x: (N, E); g, b: (1, E)
    inv_n = 1.0 / x.shape[-1]
    s1 = jnp.sum(x, axis=-1, keepdims=True)
    s2 = jnp.sum(x * x, axis=-1, keepdims=True)
    mu = s1 * inv_n
    var = s2 * inv_n - mu * mu
    return (x - mu) * lax.rsqrt(var + LN_EPS) * g + b


# ----------------------------------------------------------------------------
# Fully fused forward (per batch block):
#   x <- x + pos
#   repeat L times:  x <- x + MHA(LN1(x), key_padding_mask);  x <- x + FFN(LN2(x))
#   out <- LN_out(x)
# ----------------------------------------------------------------------------
def fused_transformer_kernel(x_ref, mask_ref, pos_ref,
                             ln1_g_ref, ln1_b_ref,
                             wqkv_ref, bqkv_ref,
                             wo_ref, bo_ref,
                             ln2_g_ref, ln2_b_ref,
                             w1_ref, b1_ref,
                             w2_ref, b2_ref,
                             out_g_ref, out_b_ref,
                             o_ref, *, nhead, num_layers):
    B, S, E = x_ref.shape            # B = batch block size (bb)
    hd = E // nhead
    scale = 1.0 / math.sqrt(hd)

    # Fused glue: positional encoding add + bool(0/1)->additive mask conversion (hoisted).
    x3 = x_ref[...] + pos_ref[...]                 # (B, S, E)
    mask_add = mask_ref[...] * (-1e9)              # (B, 1, S): 0 for valid keys, -1e9 for padded
    x = x3.reshape(B * S, E)                       # leading-dim merge only (layout-free)

    for l in range(num_layers):                    # static unroll over layers (weights stacked on L)
        # --- self-attention block (pre-norm) ---
        h = _layernorm(x, ln1_g_ref[l], ln1_b_ref[l])
        qkv = jnp.dot(h, wqkv_ref[l], preferred_element_type=jnp.float32) + bqkv_ref[l]  # (B*S, 3E)
        q = qkv[:, :E].reshape(B, S, E)
        k = qkv[:, E:2 * E].reshape(B, S, E)
        v = qkv[:, 2 * E:].reshape(B, S, E)

        wo = wo_ref[l]                             # (E, E)
        attn = jnp.zeros((B * S, E), jnp.float32)
        for hh in range(nhead):                    # static unroll; attention batched over B via einsum
            sl = slice(hh * hd, (hh + 1) * hd)
            qh, kh, vh = q[..., sl], k[..., sl], v[..., sl]                     # (B, S, hd)
            s = jnp.einsum('bqd,bkd->bqk', qh, kh,
                           preferred_element_type=jnp.float32) * scale         # (B, S, S)
            s = s + mask_add                                                    # broadcast over queries
            s = s - jnp.max(s, axis=-1, keepdims=True)
            p = jnp.exp(s)
            p = p * pl.reciprocal(jnp.sum(p, axis=-1, keepdims=True), approx=True)
            oh = jnp.einsum('bqk,bkd->bqd', p, vh,
                            preferred_element_type=jnp.float32)                 # (B, S, hd)
            # Per-head slice of the output projection; accumulation replaces head-concat.
            attn = attn + jnp.dot(oh.reshape(B * S, hd), wo[sl, :],
                                  preferred_element_type=jnp.float32)
        x = x + attn + bo_ref[l]

        # --- feed-forward block (pre-norm): Linear(E->2E) -> ReLU -> Linear(2E->E) ---
        h2 = _layernorm(x, ln2_g_ref[l], ln2_b_ref[l])
        ff = jnp.dot(h2, w1_ref[l], preferred_element_type=jnp.float32) + b1_ref[l]
        ff = jnp.maximum(ff, 0.0)
        ff = jnp.dot(ff, w2_ref[l], preferred_element_type=jnp.float32) + b2_ref[l]
        x = x + ff

    # Final output LayerNorm; single store of the whole block.
    x = _layernorm(x, out_g_ref[...], out_b_ref[...])
    o_ref[...] = x.reshape(B, S, E)


def _pick_batch_block(B, S):
    # Keep ~>=256 flattened rows per block to feed the MXU; larger batches then
    # yield multiple grid steps that megacore ("parallel") can split across cores
    # and that bound per-step VMEM use.  bb must divide B.
    bb = min(B, max(1, 256 // max(S, 1)))
    while B % bb:
        bb -= 1
    return bb


# ----------------------------------------------------------------------------
# Wrapper: one pallas_call for the whole model, grid over batch blocks.
# ----------------------------------------------------------------------------
def inter_sensor_transformer(params, x, src_key_padding_mask, nhead):
    B, S, E = x.shape
    L = params["wqkv_t"].shape[0]

    pos = params["pos"][:, :S, :]                                        # (1, S, E), static slice
    mask_f = src_key_padding_mask.astype(jnp.float32).reshape(B, 1, S)   # 1.0 = padded

    bb = _pick_batch_block(B, S)
    grid = (B // bb,)

    kernel = functools.partial(fused_transformer_kernel, nhead=nhead, num_layers=L)

    def batched(shape):
        nd = len(shape)
        return pl.BlockSpec(shape, lambda b, _nd=nd: (b,) + (0,) * (_nd - 1))

    def resident(arr):
        nd = arr.ndim
        return pl.BlockSpec(arr.shape, lambda b, _nd=nd: (0,) * _nd)

    weights = [params["ln1_g"], params["ln1_b"],
               params["wqkv_t"], params["bqkv"],
               params["wo_t"], params["bo"],
               params["ln2_g"], params["ln2_b"],
               params["w1_t"], params["b1"],
               params["w2_t"], params["b2"],
               params["out_ln_g"], params["out_ln_b"]]

    in_specs = ([batched((bb, S, E)), batched((bb, 1, S)), resident(pos)]
                + [resident(w) for w in weights])

    return pl.pallas_call(
        kernel,
        out_shape=jax.ShapeDtypeStruct((B, S, E), jnp.float32),
        grid=grid,
        in_specs=in_specs,
        out_specs=batched((bb, S, E)),
        compiler_params=pltpu.CompilerParams(
            dimension_semantics=("parallel",)),
    )(x, mask_f, pos, *weights)


# ----------------------------------------------------------------------------
# Deterministic parameter construction (shapes follow the PyTorch module).
# Per-layer parameters are stacked along a leading L axis; Linear weights are
# stored pre-transposed as (in, out).
# ----------------------------------------------------------------------------
def init_params(key, embed_dim, nhead, num_layers, max_sensors):
    E, L = embed_dim, num_layers
    ks = jax.random.split(key, 4 * L)

    def nrm(k, shape):
        return 0.02 * jax.random.normal(k, shape, jnp.float32)

    return {
        # nn.Parameter(torch.zeros(1, max_sensors, embed_dim))
        "pos": jnp.zeros((1, max_sensors, E), jnp.float32),
        "out_ln_g": jnp.ones((1, E), jnp.float32),
        "out_ln_b": jnp.zeros((1, E), jnp.float32),
        "ln1_g": jnp.ones((L, 1, E), jnp.float32),
        "ln1_b": jnp.zeros((L, 1, E), jnp.float32),
        "wqkv_t": jnp.stack([nrm(ks[4 * l + 0], (E, 3 * E)) for l in range(L)]),
        "bqkv": jnp.zeros((L, 1, 3 * E), jnp.float32),
        "wo_t": jnp.stack([nrm(ks[4 * l + 1], (E, E)) for l in range(L)]),
        "bo": jnp.zeros((L, 1, E), jnp.float32),
        "ln2_g": jnp.ones((L, 1, E), jnp.float32),
        "ln2_b": jnp.zeros((L, 1, E), jnp.float32),
        "w1_t": jnp.stack([nrm(ks[4 * l + 2], (E, 2 * E)) for l in range(L)]),
        "b1": jnp.zeros((L, 1, 2 * E), jnp.float32),
        "w2_t": jnp.stack([nrm(ks[4 * l + 3], (2 * E, E)) for l in range(L)]),
        "b2": jnp.zeros((L, 1, E), jnp.float32),
    }


if __name__ == "__main__":
    B, S, E = 2, 8, 32
    nhead = 4
    num_layers = 2
    max_sensors = 16

    key = jax.random.PRNGKey(0)
    k_param, k_x = jax.random.split(key)

    params = init_params(k_param, E, nhead, num_layers, max_sensors)
    x = jax.random.normal(k_x, (B, S, E), jnp.float32)
    # True = padded sensor (ignored as attention key); pad the last 3 sensors of batch element 1.
    src_key_padding_mask = jnp.zeros((B, S), jnp.bool_).at[1, S - 3:].set(True)

    out = inter_sensor_transformer(params, x, src_key_padding_mask, nhead)
    out = jax.block_until_ready(out)
    assert out.shape == (B, S, E) and out.dtype == jnp.float32
    print("KERNEL_OK")
</pallas_src>

<mosaic_0001>
module attributes {stable_mosaic.version = 11 : i64} {
  func.func @fused_transformer_kernel(%arg0: i32, %arg1: memref<2x8x32xf32, #tpu.memory_space<vmem>>, %arg2: memref<2x1x8xf32, #tpu.memory_space<vmem>>, %arg3: memref<1x8x32xf32, #tpu.memory_space<vmem>>, %arg4: memref<2x1x32xf32, #tpu.memory_space<vmem>>, %arg5: memref<2x1x32xf32, #tpu.memory_space<vmem>>, %arg6: memref<2x32x96xf32, #tpu.memory_space<vmem>>, %arg7: memref<2x1x96xf32, #tpu.memory_space<vmem>>, %arg8: memref<2x32x32xf32, #tpu.memory_space<vmem>>, %arg9: memref<2x1x32xf32, #tpu.memory_space<vmem>>, %arg10: memref<2x1x32xf32, #tpu.memory_space<vmem>>, %arg11: memref<2x1x32xf32, #tpu.memory_space<vmem>>, %arg12: memref<2x32x64xf32, #tpu.memory_space<vmem>>, %arg13: memref<2x1x64xf32, #tpu.memory_space<vmem>>, %arg14: memref<2x64x32xf32, #tpu.memory_space<vmem>>, %arg15: memref<2x1x32xf32, #tpu.memory_space<vmem>>, %arg16: memref<1x32xf32, #tpu.memory_space<vmem>>, %arg17: memref<1x32xf32, #tpu.memory_space<vmem>>, %arg18: memref<2x8x32xf32, #tpu.memory_space<vmem>>) attributes {dimension_semantics = [#tpu.dimension_semantics<parallel>], iteration_bounds = array<i64: 1>, scalar_prefetch = 0 : i64, scratch_operands = 0 : i64, tpu.core_type = #tpu.core_type<tc>, window_params = [{transform_indices = @transform_0, window_bounds = array<i64: 2, 8, 32>}, {transform_indices = @transform_1, window_bounds = array<i64: 2, 1, 8>}, {pipeline_mode = #tpu.pipeline_mode<synchronous>, transform_indices = @transform_2, window_bounds = array<i64: 1, 8, 32>}, {pipeline_mode = #tpu.pipeline_mode<synchronous>, transform_indices = @transform_3, window_bounds = array<i64: 2, 1, 32>}, {pipeline_mode = #tpu.pipeline_mode<synchronous>, transform_indices = @transform_4, window_bounds = array<i64: 2, 1, 32>}, {pipeline_mode = #tpu.pipeline_mode<synchronous>, transform_indices = @transform_5, window_bounds = array<i64: 2, 32, 96>}, {pipeline_mode = #tpu.pipeline_mode<synchronous>, transform_indices = @transform_6, window_bounds = array<i64: 2, 1, 96>}, {pipeline_mode = #tpu.pipeline_mode<synchronous>, transform_indices = @transform_7, window_bounds = array<i64: 2, 32, 32>}, {pipeline_mode = #tpu.pipeline_mode<synchronous>, transform_indices = @transform_8, window_bounds = array<i64: 2, 1, 32>}, {pipeline_mode = #tpu.pipeline_mode<synchronous>, transform_indices = @transform_9, window_bounds = array<i64: 2, 1, 32>}, {pipeline_mode = #tpu.pipeline_mode<synchronous>, transform_indices = @transform_10, window_bounds = array<i64: 2, 1, 32>}, {pipeline_mode = #tpu.pipeline_mode<synchronous>, transform_indices = @transform_11, window_bounds = array<i64: 2, 32, 64>}, {pipeline_mode = #tpu.pipeline_mode<synchronous>, transform_indices = @transform_12, window_bounds = array<i64: 2, 1, 64>}, {pipeline_mode = #tpu.pipeline_mode<synchronous>, transform_indices = @transform_13, window_bounds = array<i64: 2, 64, 32>}, {pipeline_mode = #tpu.pipeline_mode<synchronous>, transform_indices = @transform_14, window_bounds = array<i64: 2, 1, 32>}, {pipeline_mode = #tpu.pipeline_mode<synchronous>, transform_indices = @transform_15, window_bounds = array<i64: 1, 32>}, {pipeline_mode = #tpu.pipeline_mode<synchronous>, transform_indices = @transform_16, window_bounds = array<i64: 1, 32>}, {transform_indices = @transform_17, window_bounds = array<i64: 2, 8, 32>}]} {
    %c0 = arith.constant 0 : index
    %c0_0 = arith.constant 0 : index
    %c0_1 = arith.constant 0 : index
    %0 = vector.load %arg1[%c0, %c0_0, %c0_1] : memref<2x8x32xf32, #tpu.memory_space<vmem>>, vector<2x8x32xf32>
    %c0_2 = arith.constant 0 : index
    %c0_3 = arith.constant 0 : index
    %c0_4 = arith.constant 0 : index
    %1 = vector.load %arg3[%c0_2, %c0_3, %c0_4] : memref<1x8x32xf32, #tpu.memory_space<vmem>>, vector<1x8x32xf32>
    %2 = vector.broadcast %1 : vector<1x8x32xf32> to vector<2x8x32xf32>
    %3 = arith.addf %0, %2 : vector<2x8x32xf32>
    %c0_5 = arith.constant 0 : index
    %c0_6 = arith.constant 0 : index
    %c0_7 = arith.constant 0 : index
    %4 = vector.load %arg2[%c0_5, %c0_6, %c0_7] : memref<2x1x8xf32, #tpu.memory_space<vmem>>, vector<2x1x8xf32>
    %cst = arith.constant -1.000000e+09 : f32
    %5 = vector.broadcast %cst : f32 to vector<2x1x8xf32>
    %6 = arith.mulf %4, %5 : vector<2x1x8xf32>
    %7 = vector.shape_cast %3 : vector<2x8x32xf32> to vector<16x32xf32>
    %c0_8 = arith.constant 0 : index
    %c0_9 = arith.constant 0 : index
    %c0_10 = arith.constant 0 : index
    %8 = vector.load %arg4[%c0_8, %c0_9, %c0_10] : memref<2x1x32xf32, #tpu.memory_space<vmem>>, vector<1x1x32xf32>
    %9 = vector.shape_cast %8 : vector<1x1x32xf32> to vector<1x32xf32>
    %c0_11 = arith.constant 0 : index
    %c0_12 = arith.constant 0 : index
    %c0_13 = arith.constant 0 : index
    %10 = vector.load %arg5[%c0_11, %c0_12, %c0_13] : memref<2x1x32xf32, #tpu.memory_space<vmem>>, vector<1x1x32xf32>
    %11 = vector.shape_cast %10 : vector<1x1x32xf32> to vector<1x32xf32>
    %cst_14 = arith.constant dense<0.000000e+00> : vector<16xf32>
    %12 = vector.multi_reduction <add>, %7, %cst_14 [1] : vector<16x32xf32> to vector<16xf32>
    %13 = vector.shape_cast %12 : vector<16xf32> to vector<16x1xf32>
    %14 = arith.mulf %7, %7 : vector<16x32xf32>
    %cst_15 = arith.constant dense<0.000000e+00> : vector<16xf32>
    %15 = vector.multi_reduction <add>, %14, %cst_15 [1] : vector<16x32xf32> to vector<16xf32>
    %16 = vector.shape_cast %15 : vector<16xf32> to vector<16x1xf32>
    %cst_16 = arith.constant 3.125000e-02 : f32
    %17 = vector.broadcast %cst_16 : f32 to vector<16x1xf32>
    %18 = arith.mulf %13, %17 : vector<16x1xf32>
    %cst_17 = arith.constant 3.125000e-02 : f32
    %19 = vector.broadcast %cst_17 : f32 to vector<16x1xf32>
    %20 = arith.mulf %16, %19 : vector<16x1xf32>
    %21 = arith.mulf %18, %18 : vector<16x1xf32>
    %22 = arith.subf %20, %21 : vector<16x1xf32>
    %23 = vector.broadcast %18 : vector<16x1xf32> to vector<16x32xf32>
    %24 = arith.subf %7, %23 : vector<16x32xf32>
    %cst_18 = arith.constant 9.99999974E-6 : f32
    %25 = vector.broadcast %cst_18 : f32 to vector<16x1xf32>
    %26 = arith.addf %22, %25 : vector<16x1xf32>
    %27 = math.rsqrt %26 : vector<16x1xf32>
    %28 = vector.broadcast %27 : vector<16x1xf32> to vector<16x32xf32>
    %29 = arith.mulf %24, %28 : vector<16x32xf32>
    %30 = vector.broadcast %9 : vector<1x32xf32> to vector<16x32xf32>
    %31 = arith.mulf %29, %30 : vector<16x32xf32>
    %32 = vector.broadcast %11 : vector<1x32xf32> to vector<16x32xf32>
    %33 = arith.addf %31, %32 : vector<16x32xf32>
    %c0_19 = arith.constant 0 : index
    %c0_20 = arith.constant 0 : index
    %c0_21 = arith.constant 0 : index
    %34 = vector.load %arg6[%c0_19, %c0_20, %c0_21] : memref<2x32x96xf32, #tpu.memory_space<vmem>>, vector<1x32x96xf32>
    %35 = vector.shape_cast %34 : vector<1x32x96xf32> to vector<32x96xf32>
    %cst_22 = arith.constant dense<0.000000e+00> : vector<16x96xf32>
    %36 = tpu.matmul %33, %35, %cst_22 {dimension_numbers = #tpu.dot_dimension_numbers<[1], [0], [0], [1], [0, 0, 1, 1], [], []>} : vector<16x32xf32>, vector<32x96xf32>, vector<16x96xf32> -> vector<16x96xf32>
    %c0_23 = arith.constant 0 : index
    %c0_24 = arith.constant 0 : index
    %c0_25 = arith.constant 0 : index
    %37 = vector.load %arg7[%c0_23, %c0_24, %c0_25] : memref<2x1x96xf32, #tpu.memory_space<vmem>>, vector<1x1x96xf32>
    %38 = vector.shape_cast %37 : vector<1x1x96xf32> to vector<1x96xf32>
    %39 = vector.broadcast %38 : vector<1x96xf32> to vector<16x96xf32>
    %40 = arith.addf %36, %39 : vector<16x96xf32>
    %41 = vector.extract_strided_slice %40 {offsets = [0, 0], sizes = [16, 32], strides = [1, 1]} : vector<16x96xf32> to vector<16x32xf32>
    %42 = vector.shape_cast %41 : vector<16x32xf32> to vector<2x8x32xf32>
    %43 = vector.extract_strided_slice %40 {offsets = [0, 32], sizes = [16, 32], strides = [1, 1]} : vector<16x96xf32> to vector<16x32xf32>
    %44 = vector.shape_cast %43 : vector<16x32xf32> to vector<2x8x32xf32>
    %45 = vector.extract_strided_slice %40 {offsets = [0, 64], sizes = [16, 32], strides = [1, 1]} : vector<16x96xf32> to vector<16x32xf32>
    %46 = vector.shape_cast %45 : vector<16x32xf32> to vector<2x8x32xf32>
    %c0_26 = arith.constant 0 : index
    %c0_27 = arith.constant 0 : index
    %c0_28 = arith.constant 0 : index
    %47 = vector.load %arg8[%c0_26, %c0_27, %c0_28] : memref<2x32x32xf32, #tpu.memory_space<vmem>>, vector<1x32x32xf32>
    %48 = vector.shape_cast %47 : vector<1x32x32xf32> to vector<32x32xf32>
    %cst_29 = arith.constant 0.000000e+00 : f32
    %49 = vector.broadcast %cst_29 : f32 to vector<16x32xf32>
    %50 = vector.extract_strided_slice %42 {offsets = [0, 0, 0], sizes = [2, 8, 8], strides = [1, 1, 1]} : vector<2x8x32xf32> to vector<2x8x8xf32>
    %51 = vector.extract_strided_slice %44 {offsets = [0, 0, 0], sizes = [2, 8, 8], strides = [1, 1, 1]} : vector<2x8x32xf32> to vector<2x8x8xf32>
    %52 = vector.extract_strided_slice %46 {offsets = [0, 0, 0], sizes = [2, 8, 8], strides = [1, 1, 1]} : vector<2x8x32xf32> to vector<2x8x8xf32>
    "tpu.trace_start"() <{level = 10 : i32, message = "bqd,bkd->bqk"}> : () -> ()
    %cst_30 = arith.constant dense<0.000000e+00> : vector<2x8x8xf32>
    %53 = tpu.matmul %50, %51, %cst_30 {dimension_numbers = #tpu.dot_dimension_numbers<[2], [2], [1], [1], [0, 0, 0, 1, 1, 1], [0], [0]>} : vector<2x8x8xf32>, vector<2x8x8xf32>, vector<2x8x8xf32> -> vector<2x8x8xf32>
    "tpu.trace_stop"() : () -> ()
    %cst_31 = arith.constant 0.353553385 : f32
    %54 = vector.broadcast %cst_31 : f32 to vector<2x8x8xf32>
    %55 = arith.mulf %53, %54 : vector<2x8x8xf32>
    %56 = vector.broadcast %6 : vector<2x1x8xf32> to vector<2x8x8xf32>
    %57 = arith.addf %55, %56 : vector<2x8x8xf32>
    %cst_32 = arith.constant dense<0xFF800000> : vector<2x8xf32>
    %58 = vector.multi_reduction <maximumf>, %57, %cst_32 [2] : vector<2x8x8xf32> to vector<2x8xf32>
    %59 = vector.shape_cast %58 : vector<2x8xf32> to vector<2x8x1xf32>
    %60 = vector.broadcast %59 : vector<2x8x1xf32> to vector<2x8x8xf32>
    %61 = arith.subf %57, %60 : vector<2x8x8xf32>
    %62 = math.exp %61 : vector<2x8x8xf32>
    %cst_33 = arith.constant dense<0.000000e+00> : vector<2x8xf32>
    %63 = vector.multi_reduction <add>, %62, %cst_33 [2] : vector<2x8x8xf32> to vector<2x8xf32>
    %64 = vector.shape_cast %63 : vector<2x8xf32> to vector<2x8x1xf32>
    %65 = tpu.reciprocal %64 {approx = true} : vector<2x8x1xf32> -> vector<2x8x1xf32>
    %66 = vector.broadcast %65 : vector<2x8x1xf32> to vector<2x8x8xf32>
    %67 = arith.mulf %62, %66 : vector<2x8x8xf32>
    "tpu.trace_start"() <{level = 10 : i32, message = "bqk,bkd->bqd"}> : () -> ()
    %cst_34 = arith.constant dense<0.000000e+00> : vector<2x8x8xf32>
    %68 = tpu.matmul %67, %52, %cst_34 {dimension_numbers = #tpu.dot_dimension_numbers<[2], [1], [1], [2], [0, 0, 0, 1, 1, 2], [0], [0]>} : vector<2x8x8xf32>, vector<2x8x8xf32>, vector<2x8x8xf32> -> vector<2x8x8xf32>
    "tpu.trace_stop"() : () -> ()
    %69 = vector.shape_cast %68 : vector<2x8x8xf32> to vector<16x8xf32>
    %70 = vector.extract_strided_slice %48 {offsets = [0, 0], sizes = [8, 32], strides = [1, 1]} : vector<32x32xf32> to vector<8x32xf32>
    %cst_35 = arith.constant dense<0.000000e+00> : vector<16x32xf32>
    %71 = tpu.matmul %69, %70, %cst_35 {dimension_numbers = #tpu.dot_dimension_numbers<[1], [0], [0], [1], [0, 0, 1, 1], [], []>} : vector<16x8xf32>, vector<8x32xf32>, vector<16x32xf32> -> vector<16x32xf32>
    %72 = arith.addf %49, %71 : vector<16x32xf32>
    %73 = vector.extract_strided_slice %42 {offsets = [0, 0, 8], sizes = [2, 8, 8], strides = [1, 1, 1]} : vector<2x8x32xf32> to vector<2x8x8xf32>
    %74 = vector.extract_strided_slice %44 {offsets = [0, 0, 8], sizes = [2, 8, 8], strides = [1, 1, 1]} : vector<2x8x32xf32> to vector<2x8x8xf32>
    %75 = vector.extract_strided_slice %46 {offsets = [0, 0, 8], sizes = [2, 8, 8], strides = [1, 1, 1]} : vector<2x8x32xf32> to vector<2x8x8xf32>
    "tpu.trace_start"() <{level = 10 : i32, message = "bqd,bkd->bqk"}> : () -> ()
    %cst_36 = arith.constant dense<0.000000e+00> : vector<2x8x8xf32>
    %76 = tpu.matmul %73, %74, %cst_36 {dimension_numbers = #tpu.dot_dimension_numbers<[2], [2], [1], [1], [0, 0, 0, 1, 1, 1], [0], [0]>} : vector<2x8x8xf32>, vector<2x8x8xf32>, vector<2x8x8xf32> -> vector<2x8x8xf32>
    "tpu.trace_stop"() : () -> ()
    %cst_37 = arith.constant 0.353553385 : f32
    %77 = vector.broadcast %cst_37 : f32 to vector<2x8x8xf32>
    %78 = arith.mulf %76, %77 : vector<2x8x8xf32>
    %79 = vector.broadcast %6 : vector<2x1x8xf32> to vector<2x8x8xf32>
    %80 = arith.addf %78, %79 : vector<2x8x8xf32>
    %cst_38 = arith.constant dense<0xFF800000> : vector<2x8xf32>
    %81 = vector.multi_reduction <maximumf>, %80, %cst_38 [2] : vector<2x8x8xf32> to vector<2x8xf32>
    %82 = vector.shape_cast %81 : vector<2x8xf32> to vector<2x8x1xf32>
    %83 = vector.broadcast %82 : vector<2x8x1xf32> to vector<2x8x8xf32>
    %84 = arith.subf %80, %83 : vector<2x8x8xf32>
    %85 = math.exp %84 : vector<2x8x8xf32>
    %cst_39 = arith.constant dense<0.000000e+00> : vector<2x8xf32>
    %86 = vector.multi_reduction <add>, %85, %cst_39 [2] : vector<2x8x8xf32> to vector<2x8xf32>
    %87 = vector.shape_cast %86 : vector<2x8xf32> to vector<2x8x1xf32>
    %88 = tpu.reciprocal %87 {approx = true} : vector<2x8x1xf32> -> vector<2x8x1xf32>
    %89 = vector.broadcast %88 : vector<2x8x1xf32> to vector<2x8x8xf32>
    %90 = arith.mulf %85, %89 : vector<2x8x8xf32>
    "tpu.trace_start"() <{level = 10 : i32, message = "bqk,bkd->bqd"}> : () -> ()
    %cst_40 = arith.constant dense<0.000000e+00> : vector<2x8x8xf32>
    %91 = tpu.matmul %90, %75, %cst_40 {dimension_numbers = #tpu.dot_dimension_numbers<[2], [1], [1], [2], [0, 0, 0, 1, 1, 2], [0], [0]>} : vector<2x8x8xf32>, vector<2x8x8xf32>, vector<2x8x8xf32> -> vector<2x8x8xf32>
    "tpu.trace_stop"() : () -> ()
    %92 = vector.shape_cast %91 : vector<2x8x8xf32> to vector<16x8xf32>
    %93 = vector.extract_strided_slice %48 {offsets = [8, 0], sizes = [8, 32], strides = [1, 1]} : vector<32x32xf32> to vector<8x32xf32>
    %cst_41 = arith.constant dense<0.000000e+00> : vector<16x32xf32>
    %94 = tpu.matmul %92, %93, %cst_41 {dimension_numbers = #tpu.dot_dimension_numbers<[1], [0], [0], [1], [0, 0, 1, 1], [], []>} : vector<16x8xf32>, vector<8x32xf32>, vector<16x32xf32> -> vector<16x32xf32>
    %95 = arith.addf %72, %94 : vector<16x32xf32>
    %96 = vector.extract_strided_slice %42 {offsets = [0, 0, 16], sizes = [2, 8, 8], strides = [1, 1, 1]} : vector<2x8x32xf32> to vector<2x8x8xf32>
    %97 = vector.extract_strided_slice %44 {offsets = [0, 0, 16], sizes = [2, 8, 8], strides = [1, 1, 1]} : vector<2x8x32xf32> to vector<2x8x8xf32>
    %98 = vector.extract_strided_slice %46 {offsets = [0, 0, 16], sizes = [2, 8, 8], strides = [1, 1, 1]} : vector<2x8x32xf32> to vector<2x8x8xf32>
    "tpu.trace_start"() <{level = 10 : i32, message = "bqd,bkd->bqk"}> : () -> ()
    %cst_42 = arith.constant dense<0.000000e+00> : vector<2x8x8xf32>
    %99 = tpu.matmul %96, %97, %cst_42 {dimension_numbers = #tpu.dot_dimension_numbers<[2], [2], [1], [1], [0, 0, 0, 1, 1, 1], [0], [0]>} : vector<2x8x8xf32>, vector<2x8x8xf32>, vector<2x8x8xf32> -> vector<2x8x8xf32>
    "tpu.trace_stop"() : () -> ()
    %cst_43 = arith.constant 0.353553385 : f32
    %100 = vector.broadcast %cst_43 : f32 to vector<2x8x8xf32>
    %101 = arith.mulf %99, %100 : vector<2x8x8xf32>
    %102 = vector.broadcast %6 : vector<2x1x8xf32> to vector<2x8x8xf32>
    %103 = arith.addf %101, %102 : vector<2x8x8xf32>
    %cst_44 = arith.constant dense<0xFF800000> : vector<2x8xf32>
    %104 = vector.multi_reduction <maximumf>, %103, %cst_44 [2] : vector<2x8x8xf32> to vector<2x8xf32>
    %105 = vector.shape_cast %104 : vector<2x8xf32> to vector<2x8x1xf32>
    %106 = vector.broadcast %105 : vector<2x8x1xf32> to vector<2x8x8xf32>
    %107 = arith.subf %103, %106 : vector<2x8x8xf32>
    %108 = math.exp %107 : vector<2x8x8xf32>
    %cst_45 = arith.constant dense<0.000000e+00> : vector<2x8xf32>
    %109 = vector.multi_reduction <add>, %108, %cst_45 [2] : vector<2x8x8xf32> to vector<2x8xf32>
    %110 = vector.shape_cast %109 : vector<2x8xf32> to vector<2x8x1xf32>
    %111 = tpu.reciprocal %110 {approx = true} : vector<2x8x1xf32> -> vector<2x8x1xf32>
    %112 = vector.broadcast %111 : vector<2x8x1xf32> to vector<2x8x8xf32>
    %113 = arith.mulf %108, %112 : vector<2x8x8xf32>
    "tpu.trace_start"() <{level = 10 : i32, message = "bqk,bkd->bqd"}> : () -> ()
    %cst_46 = arith.constant dense<0.000000e+00> : vector<2x8x8xf32>
    %114 = tpu.matmul %113, %98, %cst_46 {dimension_numbers = #tpu.dot_dimension_numbers<[2], [1], [1], [2], [0, 0, 0, 1, 1, 2], [0], [0]>} : vector<2x8x8xf32>, vector<2x8x8xf32>, vector<2x8x8xf32> -> vector<2x8x8xf32>
    "tpu.trace_stop"() : () -> ()
    %115 = vector.shape_cast %114 : vector<2x8x8xf32> to vector<16x8xf32>
    %116 = vector.extract_strided_slice %48 {offsets = [16, 0], sizes = [8, 32], strides = [1, 1]} : vector<32x32xf32> to vector<8x32xf32>
    %cst_47 = arith.constant dense<0.000000e+00> : vector<16x32xf32>
    %117 = tpu.matmul %115, %116, %cst_47 {dimension_numbers = #tpu.dot_dimension_numbers<[1], [0], [0], [1], [0, 0, 1, 1], [], []>} : vector<16x8xf32>, vector<8x32xf32>, vector<16x32xf32> -> vector<16x32xf32>
    %118 = arith.addf %95, %117 : vector<16x32xf32>
    %119 = vector.extract_strided_slice %42 {offsets = [0, 0, 24], sizes = [2, 8, 8], strides = [1, 1, 1]} : vector<2x8x32xf32> to vector<2x8x8xf32>
    %120 = vector.extract_strided_slice %44 {offsets = [0, 0, 24], sizes = [2, 8, 8], strides = [1, 1, 1]} : vector<2x8x32xf32> to vector<2x8x8xf32>
    %121 = vector.extract_strided_slice %46 {offsets = [0, 0, 24], sizes = [2, 8, 8], strides = [1, 1, 1]} : vector<2x8x32xf32> to vector<2x8x8xf32>
    "tpu.trace_start"() <{level = 10 : i32, message = "bqd,bkd->bqk"}> : () -> ()
    %cst_48 = arith.constant dense<0.000000e+00> : vector<2x8x8xf32>
    %122 = tpu.matmul %119, %120, %cst_48 {dimension_numbers = #tpu.dot_dimension_numbers<[2], [2], [1], [1], [0, 0, 0, 1, 1, 1], [0], [0]>} : vector<2x8x8xf32>, vector<2x8x8xf32>, vector<2x8x8xf32> -> vector<2x8x8xf32>
    "tpu.trace_stop"() : () -> ()
    %cst_49 = arith.constant 0.353553385 : f32
    %123 = vector.broadcast %cst_49 : f32 to vector<2x8x8xf32>
    %124 = arith.mulf %122, %123 : vector<2x8x8xf32>
    %125 = vector.broadcast %6 : vector<2x1x8xf32> to vector<2x8x8xf32>
    %126 = arith.addf %124, %125 : vector<2x8x8xf32>
    %cst_50 = arith.constant dense<0xFF800000> : vector<2x8xf32>
    %127 = vector.multi_reduction <maximumf>, %126, %cst_50 [2] : vector<2x8x8xf32> to vector<2x8xf32>
    %128 = vector.shape_cast %127 : vector<2x8xf32> to vector<2x8x1xf32>
    %129 = vector.broadcast %128 : vector<2x8x1xf32> to vector<2x8x8xf32>
    %130 = arith.subf %126, %129 : vector<2x8x8xf32>
    %131 = math.exp %130 : vector<2x8x8xf32>
    %cst_51 = arith.constant dense<0.000000e+00> : vector<2x8xf32>
    %132 = vector.multi_reduction <add>, %131, %cst_51 [2] : vector<2x8x8xf32> to vector<2x8xf32>
    %133 = vector.shape_cast %132 : vector<2x8xf32> to vector<2x8x1xf32>
    %134 = tpu.reciprocal %133 {approx = true} : vector<2x8x1xf32> -> vector<2x8x1xf32>
    %135 = vector.broadcast %134 : vector<2x8x1xf32> to vector<2x8x8xf32>
    %136 = arith.mulf %131, %135 : vector<2x8x8xf32>
    "tpu.trace_start"() <{level = 10 : i32, message = "bqk,bkd->bqd"}> : () -> ()
    %cst_52 = arith.constant dense<0.000000e+00> : vector<2x8x8xf32>
    %137 = tpu.matmul %136, %121, %cst_52 {dimension_numbers = #tpu.dot_dimension_numbers<[2], [1], [1], [2], [0, 0, 0, 1, 1, 2], [0], [0]>} : vector<2x8x8xf32>, vector<2x8x8xf32>, vector<2x8x8xf32> -> vector<2x8x8xf32>
    "tpu.trace_stop"() : () -> ()
    %138 = vector.shape_cast %137 : vector<2x8x8xf32> to vector<16x8xf32>
    %139 = vector.extract_strided_slice %48 {offsets = [24, 0], sizes = [8, 32], strides = [1, 1]} : vector<32x32xf32> to vector<8x32xf32>
    %cst_53 = arith.constant dense<0.000000e+00> : vector<16x32xf32>
    %140 = tpu.matmul %138, %139, %cst_53 {dimension_numbers = #tpu.dot_dimension_numbers<[1], [0], [0], [1], [0, 0, 1, 1], [], []>} : vector<16x8xf32>, vector<8x32xf32>, vector<16x32xf32> -> vector<16x32xf32>
    %141 = arith.addf %118, %140 : vector<16x32xf32>
    %142 = arith.addf %7, %141 : vector<16x32xf32>
    %c0_54 = arith.constant 0 : index
    %c0_55 = arith.constant 0 : index
    %c0_56 = arith.constant 0 : index
    %143 = vector.load %arg9[%c0_54, %c0_55, %c0_56] : memref<2x1x32xf32, #tpu.memory_space<vmem>>, vector<1x1x32xf32>
    %144 = vector.shape_cast %143 : vector<1x1x32xf32> to vector<1x32xf32>
    %145 = vector.broadcast %144 : vector<1x32xf32> to vector<16x32xf32>
    %146 = arith.addf %142, %145 : vector<16x32xf32>
    %c0_57 = arith.constant 0 : index
    %c0_58 = arith.constant 0 : index
    %c0_59 = arith.constant 0 : index
    %147 = vector.load %arg10[%c0_57, %c0_58, %c0_59] : memref<2x1x32xf32, #tpu.memory_space<vmem>>, vector<1x1x32xf32>
    %148 = vector.shape_cast %147 : vector<1x1x32xf32> to vector<1x32xf32>
    %c0_60 = arith.constant 0 : index
    %c0_61 = arith.constant 0 : index
    %c0_62 = arith.constant 0 : index
    %149 = vector.load %arg11[%c0_60, %c0_61, %c0_62] : memref<2x1x32xf32, #tpu.memory_space<vmem>>, vector<1x1x32xf32>
    %150 = vector.shape_cast %149 : vector<1x1x32xf32> to vector<1x32xf32>
    %cst_63 = arith.constant dense<0.000000e+00> : vector<16xf32>
    %151 = vector.multi_reduction <add>, %146, %cst_63 [1] : vector<16x32xf32> to vector<16xf32>
    %152 = vector.shape_cast %151 : vector<16xf32> to vector<16x1xf32>
    %153 = arith.mulf %146, %146 : vector<16x32xf32>
    %cst_64 = arith.constant dense<0.000000e+00> : vector<16xf32>
    %154 = vector.multi_reduction <add>, %153, %cst_64 [1] : vector<16x32xf32> to vector<16xf32>
    %155 = vector.shape_cast %154 : vector<16xf32> to vector<16x1xf32>
    %cst_65 = arith.constant 3.125000e-02 : f32
    %156 = vector.broadcast %cst_65 : f32 to vector<16x1xf32>
    %157 = arith.mulf %152, %156 : vector<16x1xf32>
    %cst_66 = arith.constant 3.125000e-02 : f32
    %158 = vector.broadcast %cst_66 : f32 to vector<16x1xf32>
    %159 = arith.mulf %155, %158 : vector<16x1xf32>
    %160 = arith.mulf %157, %157 : vector<16x1xf32>
    %161 = arith.subf %159, %160 : vector<16x1xf32>
    %162 = vector.broadcast %157 : vector<16x1xf32> to vector<16x32xf32>
    %163 = arith.subf %146, %162 : vector<16x32xf32>
    %cst_67 = arith.constant 9.99999974E-6 : f32
    %164 = vector.broadcast %cst_67 : f32 to vector<16x1xf32>
    %165 = arith.addf %161, %164 : vector<16x1xf32>
    %166 = math.rsqrt %165 : vector<16x1xf32>
    %167 = vector.broadcast %166 : vector<16x1xf32> to vector<16x32xf32>
    %168 = arith.mulf %163, %167 : vector<16x32xf32>
    %169 = vector.broadcast %148 : vector<1x32xf32> to vector<16x32xf32>
    %170 = arith.mulf %168, %169 : vector<16x32xf32>
    %171 = vector.broadcast %150 : vector<1x32xf32> to vector<16x32xf32>
    %172 = arith.addf %170, %171 : vector<16x32xf32>
    %c0_68 = arith.constant 0 : index
    %c0_69 = arith.constant 0 : index
    %c0_70 = arith.constant 0 : index
    %173 = vector.load %arg12[%c0_68, %c0_69, %c0_70] : memref<2x32x64xf32, #tpu.memory_space<vmem>>, vector<1x32x64xf32>
    %174 = vector.shape_cast %173 : vector<1x32x64xf32> to vector<32x64xf32>
    %cst_71 = arith.constant dense<0.000000e+00> : vector<16x64xf32>
    %175 = tpu.matmul %172, %174, %cst_71 {dimension_numbers = #tpu.dot_dimension_numbers<[1], [0], [0], [1], [0, 0, 1, 1], [], []>} : vector<16x32xf32>, vector<32x64xf32>, vector<16x64xf32> -> vector<16x64xf32>
    %c0_72 = arith.constant 0 : index
    %c0_73 = arith.constant 0 : index
    %c0_74 = arith.constant 0 : index
    %176 = vector.load %arg13[%c0_72, %c0_73, %c0_74] : memref<2x1x64xf32, #tpu.memory_space<vmem>>, vector<1x1x64xf32>
    %177 = vector.shape_cast %176 : vector<1x1x64xf32> to vector<1x64xf32>
    %178 = vector.broadcast %177 : vector<1x64xf32> to vector<16x64xf32>
    %179 = arith.addf %175, %178 : vector<16x64xf32>
    %cst_75 = arith.constant 0.000000e+00 : f32
    %180 = vector.broadcast %cst_75 : f32 to vector<16x64xf32>
    %181 = arith.maximumf %179, %180 : vector<16x64xf32>
    %c0_76 = arith.constant 0 : index
    %c0_77 = arith.constant 0 : index
    %c0_78 = arith.constant 0 : index
    %182 = vector.load %arg14[%c0_76, %c0_77, %c0_78] : memref<2x64x32xf32, #tpu.memory_space<vmem>>, vector<1x64x32xf32>
    %183 = vector.shape_cast %182 : vector<1x64x32xf32> to vector<64x32xf32>
    %cst_79 = arith.constant dense<0.000000e+00> : vector<16x32xf32>
    %184 = tpu.matmul %181, %183, %cst_79 {dimension_numbers = #tpu.dot_dimension_numbers<[1], [0], [0], [1], [0, 0, 1, 1], [], []>} : vector<16x64xf32>, vector<64x32xf32>, vector<16x32xf32> -> vector<16x32xf32>
    %c0_80 = arith.constant 0 : index
    %c0_81 = arith.constant 0 : index
    %c0_82 = arith.constant 0 : index
    %185 = vector.load %arg15[%c0_80, %c0_81, %c0_82] : memref<2x1x32xf32, #tpu.memory_space<vmem>>, vector<1x1x32xf32>
    %186 = vector.shape_cast %185 : vector<1x1x32xf32> to vector<1x32xf32>
    %187 = vector.broadcast %186 : vector<1x32xf32> to vector<16x32xf32>
    %188 = arith.addf %184, %187 : vector<16x32xf32>
    %189 = arith.addf %146, %188 : vector<16x32xf32>
    %c1 = arith.constant 1 : index
    %c0_83 = arith.constant 0 : index
    %c0_84 = arith.constant 0 : index
    %190 = vector.load %arg4[%c1, %c0_83, %c0_84] : memref<2x1x32xf32, #tpu.memory_space<vmem>>, vector<1x1x32xf32>
    %191 = vector.shape_cast %190 : vector<1x1x32xf32> to vector<1x32xf32>
    %c1_85 = arith.constant 1 : index
    %c0_86 = arith.constant 0 : index
    %c0_87 = arith.constant 0 : index
    %192 = vector.load %arg5[%c1_85, %c0_86, %c0_87] : memref<2x1x32xf32, #tpu.memory_space<vmem>>, vector<1x1x32xf32>
    %193 = vector.shape_cast %192 : vector<1x1x32xf32> to vector<1x32xf32>
    %cst_88 = arith.constant dense<0.000000e+00> : vector<16xf32>
    %194 = vector.multi_reduction <add>, %189, %cst_88 [1] : vector<16x32xf32> to vector<16xf32>
    %195 = vector.shape_cast %194 : vector<16xf32> to vector<16x1xf32>
    %196 = arith.mulf %189, %189 : vector<16x32xf32>
    %cst_89 = arith.constant dense<0.000000e+00> : vector<16xf32>
    %197 = vector.multi_reduction <add>, %196, %cst_89 [1] : vector<16x32xf32> to vector<16xf32>
    %198 = vector.shape_cast %197 : vector<16xf32> to vector<16x1xf32>
    %cst_90 = arith.constant 3.125000e-02 : f32
    %199 = vector.broadcast %cst_90 : f32 to vector<16x1xf32>
    %200 = arith.mulf %195, %199 : vector<16x1xf32>
    %cst_91 = arith.constant 3.125000e-02 : f32
    %201 = vector.broadcast %cst_91 : f32 to vector<16x1xf32>
    %202 = arith.mulf %198, %201 : vector<16x1xf32>
    %203 = arith.mulf %200, %200 : vector<16x1xf32>
    %204 = arith.subf %202, %203 : vector<16x1xf32>
    %205 = vector.broadcast %200 : vector<16x1xf32> to vector<16x32xf32>
    %206 = arith.subf %189, %205 : vector<16x32xf32>
    %cst_92 = arith.constant 9.99999974E-6 : f32
    %207 = vector.broadcast %cst_92 : f32 to vector<16x1xf32>
    %208 = arith.addf %204, %207 : vector<16x1xf32>
    %209 = math.rsqrt %208 : vector<16x1xf32>
    %210 = vector.broadcast %209 : vector<16x1xf32> to vector<16x32xf32>
    %211 = arith.mulf %206, %210 : vector<16x32xf32>
    %212 = vector.broadcast %191 : vector<1x32xf32> to vector<16x32xf32>
    %213 = arith.mulf %211, %212 : vector<16x32xf32>
    %214 = vector.broadcast %193 : vector<1x32xf32> to vector<16x32xf32>
    %215 = arith.addf %213, %214 : vector<16x32xf32>
    %c1_93 = arith.constant 1 : index
    %c0_94 = arith.constant 0 : index
    %c0_95 = arith.constant 0 : index
    %216 = vector.load %arg6[%c1_93, %c0_94, %c0_95] : memref<2x32x96xf32, #tpu.memory_space<vmem>>, vector<1x32x96xf32>
    %217 = vector.shape_cast %216 : vector<1x32x96xf32> to vector<32x96xf32>
    %cst_96 = arith.constant dense<0.000000e+00> : vector<16x96xf32>
    %218 = tpu.matmul %215, %217, %cst_96 {dimension_numbers = #tpu.dot_dimension_numbers<[1], [0], [0], [1], [0, 0, 1, 1], [], []>} : vector<16x32xf32>, vector<32x96xf32>, vector<16x96xf32> -> vector<16x96xf32>
    %c1_97 = arith.constant 1 : index
    %c0_98 = arith.constant 0 : index
    %c0_99 = arith.constant 0 : index
    %219 = vector.load %arg7[%c1_97, %c0_98, %c0_99] : memref<2x1x96xf32, #tpu.memory_space<vmem>>, vector<1x1x96xf32>
    %220 = vector.shape_cast %219 : vector<1x1x96xf32> to vector<1x96xf32>
    %221 = vector.broadcast %220 : vector<1x96xf32> to vector<16x96xf32>
    %222 = arith.addf %218, %221 : vector<16x96xf32>
    %223 = vector.extract_strided_slice %222 {offsets = [0, 0], sizes = [16, 32], strides = [1, 1]} : vector<16x96xf32> to vector<16x32xf32>
    %224 = vector.shape_cast %223 : vector<16x32xf32> to vector<2x8x32xf32>
    %225 = vector.extract_strided_slice %222 {offsets = [0, 32], sizes = [16, 32], strides = [1, 1]} : vector<16x96xf32> to vector<16x32xf32>
    %226 = vector.shape_cast %225 : vector<16x32xf32> to vector<2x8x32xf32>
    %227 = vector.extract_strided_slice %222 {offsets = [0, 64], sizes = [16, 32], strides = [1, 1]} : vector<16x96xf32> to vector<16x32xf32>
    %228 = vector.shape_cast %227 : vector<16x32xf32> to vector<2x8x32xf32>
    %c1_100 = arith.constant 1 : index
    %c0_101 = arith.constant 0 : index
    %c0_102 = arith.constant 0 : index
    %229 = vector.load %arg8[%c1_100, %c0_101, %c0_102] : memref<2x32x32xf32, #tpu.memory_space<vmem>>, vector<1x32x32xf32>
    %230 = vector.shape_cast %229 : vector<1x32x32xf32> to vector<32x32xf32>
    %cst_103 = arith.constant 0.000000e+00 : f32
    %231 = vector.broadcast %cst_103 : f32 to vector<16x32xf32>
    %232 = vector.extract_strided_slice %224 {offsets = [0, 0, 0], sizes = [2, 8, 8], strides = [1, 1, 1]} : vector<2x8x32xf32> to vector<2x8x8xf32>
    %233 = vector.extract_strided_slice %226 {offsets = [0, 0, 0], sizes = [2, 8, 8], strides = [1, 1, 1]} : vector<2x8x32xf32> to vector<2x8x8xf32>
    %234 = vector.extract_strided_slice %228 {offsets = [0, 0, 0], sizes = [2, 8, 8], strides = [1, 1, 1]} : vector<2x8x32xf32> to vector<2x8x8xf32>
    "tpu.trace_start"() <{level = 10 : i32, message = "bqd,bkd->bqk"}> : () -> ()
    %cst_104 = arith.constant dense<0.000000e+00> : vector<2x8x8xf32>
    %235 = tpu.matmul %232, %233, %cst_104 {dimension_numbers = #tpu.dot_dimension_numbers<[2], [2], [1], [1], [0, 0, 0, 1, 1, 1], [0], [0]>} : vector<2x8x8xf32>, vector<2x8x8xf32>, vector<2x8x8xf32> -> vector<2x8x8xf32>
    "tpu.trace_stop"() : () -> ()
    %cst_105 = arith.constant 0.353553385 : f32
    %236 = vector.broadcast %cst_105 : f32 to vector<2x8x8xf32>
    %237 = arith.mulf %235, %236 : vector<2x8x8xf32>
    %238 = vector.broadcast %6 : vector<2x1x8xf32> to vector<2x8x8xf32>
    %239 = arith.addf %237, %238 : vector<2x8x8xf32>
    %cst_106 = arith.constant dense<0xFF800000> : vector<2x8xf32>
    %240 = vector.multi_reduction <maximumf>, %239, %cst_106 [2] : vector<2x8x8xf32> to vector<2x8xf32>
    %241 = vector.shape_cast %240 : vector<2x8xf32> to vector<2x8x1xf32>
    %242 = vector.broadcast %241 : vector<2x8x1xf32> to vector<2x8x8xf32>
    %243 = arith.subf %239, %242 : vector<2x8x8xf32>
    %244 = math.exp %243 : vector<2x8x8xf32>
    %cst_107 = arith.constant dense<0.000000e+00> : vector<2x8xf32>
    %245 = vector.multi_reduction <add>, %244, %cst_107 [2] : vector<2x8x8xf32> to vector<2x8xf32>
    %246 = vector.shape_cast %245 : vector<2x8xf32> to vector<2x8x1xf32>
    %247 = tpu.reciprocal %246 {approx = true} : vector<2x8x1xf32> -> vector<2x8x1xf32>
    %248 = vector.broadcast %247 : vector<2x8x1xf32> to vector<2x8x8xf32>
    %249 = arith.mulf %244, %248 : vector<2x8x8xf32>
    "tpu.trace_start"() <{level = 10 : i32, message = "bqk,bkd->bqd"}> : () -> ()
    %cst_108 = arith.constant dense<0.000000e+00> : vector<2x8x8xf32>
    %250 = tpu.matmul %249, %234, %cst_108 {dimension_numbers = #tpu.dot_dimension_numbers<[2], [1], [1], [2], [0, 0, 0, 1, 1, 2], [0], [0]>} : vector<2x8x8xf32>, vector<2x8x8xf32>, vector<2x8x8xf32> -> vector<2x8x8xf32>
    "tpu.trace_stop"() : () -> ()
    %251 = vector.shape_cast %250 : vector<2x8x8xf32> to vector<16x8xf32>
    %252 = vector.extract_strided_slice %230 {offsets = [0, 0], sizes = [8, 32], strides = [1, 1]} : vector<32x32xf32> to vector<8x32xf32>
    %cst_109 = arith.constant dense<0.000000e+00> : vector<16x32xf32>
    %253 = tpu.matmul %251, %252, %cst_109 {dimension_numbers = #tpu.dot_dimension_numbers<[1], [0], [0], [1], [0, 0, 1, 1], [], []>} : vector<16x8xf32>, vector<8x32xf32>, vector<16x32xf32> -> vector<16x32xf32>
    %254 = arith.addf %231, %253 : vector<16x32xf32>
    %255 = vector.extract_strided_slice %224 {offsets = [0, 0, 8], sizes = [2, 8, 8], strides = [1, 1, 1]} : vector<2x8x32xf32> to vector<2x8x8xf32>
    %256 = vector.extract_strided_slice %226 {offsets = [0, 0, 8], sizes = [2, 8, 8], strides = [1, 1, 1]} : vector<2x8x32xf32> to vector<2x8x8xf32>
    %257 = vector.extract_strided_slice %228 {offsets = [0, 0, 8], sizes = [2, 8, 8], strides = [1, 1, 1]} : vector<2x8x32xf32> to vector<2x8x8xf32>
    "tpu.trace_start"() <{level = 10 : i32, message = "bqd,bkd->bqk"}> : () -> ()
    %cst_110 = arith.constant dense<0.000000e+00> : vector<2x8x8xf32>
    %258 = tpu.matmul %255, %256, %cst_110 {dimension_numbers = #tpu.dot_dimension_numbers<[2], [2], [1], [1], [0, 0, 0, 1, 1, 1], [0], [0]>} : vector<2x8x8xf32>, vector<2x8x8xf32>, vector<2x8x8xf32> -> vector<2x8x8xf32>
    "tpu.trace_stop"() : () -> ()
    %cst_111 = arith.constant 0.353553385 : f32
    %259 = vector.broadcast %cst_111 : f32 to vector<2x8x8xf32>
    %260 = arith.mulf %258, %259 : vector<2x8x8xf32>
    %261 = vector.broadcast %6 : vector<2x1x8xf32> to vector<2x8x8xf32>
    %262 = arith.addf %260, %261 : vector<2x8x8xf32>
    %cst_112 = arith.constant dense<0xFF800000> : vector<2x8xf32>
    %263 = vector.multi_reduction <maximumf>, %262, %cst_112 [2] : vector<2x8x8xf32> to vector<2x8xf32>
    %264 = vector.shape_cast %263 : vector<2x8xf32> to vector<2x8x1xf32>
    %265 = vector.broadcast %264 : vector<2x8x1xf32> to vector<2x8x8xf32>
    %266 = arith.subf %262, %265 : vector<2x8x8xf32>
    %267 = math.exp %266 : vector<2x8x8xf32>
    %cst_113 = arith.constant dense<0.000000e+00> : vector<2x8xf32>
    %268 = vector.multi_reduction <add>, %267, %cst_113 [2] : vector<2x8x8xf32> to vector<2x8xf32>
    %269 = vector.shape_cast %268 : vector<2x8xf32> to vector<2x8x1xf32>
    %270 = tpu.reciprocal %269 {approx = true} : vector<2x8x1xf32> -> vector<2x8x1xf32>
    %271 = vector.broadcast %270 : vector<2x8x1xf32> to vector<2x8x8xf32>
    %272 = arith.mulf %267, %271 : vector<2x8x8xf32>
    "tpu.trace_start"() <{level = 10 : i32, message = "bqk,bkd->bqd"}> : () -> ()
    %cst_114 = arith.constant dense<0.000000e+00> : vector<2x8x8xf32>
    %273 = tpu.matmul %272, %257, %cst_114 {dimension_numbers = #tpu.dot_dimension_numbers<[2], [1], [1], [2], [0, 0, 0, 1, 1, 2], [0], [0]>} : vector<2x8x8xf32>, vector<2x8x8xf32>, vector<2x8x8xf32> -> vector<2x8x8xf32>
    "tpu.trace_stop"() : () -> ()
    %274 = vector.shape_cast %273 : vector<2x8x8xf32> to vector<16x8xf32>
    %275 = vector.extract_strided_slice %230 {offsets = [8, 0], sizes = [8, 32], strides = [1, 1]} : vector<32x32xf32> to vector<8x32xf32>
    %cst_115 = arith.constant dense<0.000000e+00> : vector<16x32xf32>
    %276 = tpu.matmul %274, %275, %cst_115 {dimension_numbers = #tpu.dot_dimension_numbers<[1], [0], [0], [1], [0, 0, 1, 1], [], []>} : vector<16x8xf32>, vector<8x32xf32>, vector<16x32xf32> -> vector<16x32xf32>
    %277 = arith.addf %254, %276 : vector<16x32xf32>
    %278 = vector.extract_strided_slice %224 {offsets = [0, 0, 16], sizes = [2, 8, 8], strides = [1, 1, 1]} : vector<2x8x32xf32> to vector<2x8x8xf32>
    %279 = vector.extract_strided_slice %226 {offsets = [0, 0, 16], sizes = [2, 8, 8], strides = [1, 1, 1]} : vector<2x8x32xf32> to vector<2x8x8xf32>
    %280 = vector.extract_strided_slice %228 {offsets = [0, 0, 16], sizes = [2, 8, 8], strides = [1, 1, 1]} : vector<2x8x32xf32> to vector<2x8x8xf32>
    "tpu.trace_start"() <{level = 10 : i32, message = "bqd,bkd->bqk"}> : () -> ()
    %cst_116 = arith.constant dense<0.000000e+00> : vector<2x8x8xf32>
    %281 = tpu.matmul %278, %279, %cst_116 {dimension_numbers = #tpu.dot_dimension_numbers<[2], [2], [1], [1], [0, 0, 0, 1, 1, 1], [0], [0]>} : vector<2x8x8xf32>, vector<2x8x8xf32>, vector<2x8x8xf32> -> vector<2x8x8xf32>
    "tpu.trace_stop"() : () -> ()
    %cst_117 = arith.constant 0.353553385 : f32
    %282 = vector.broadcast %cst_117 : f32 to vector<2x8x8xf32>
    %283 = arith.mulf %281, %282 : vector<2x8x8xf32>
    %284 = vector.broadcast %6 : vector<2x1x8xf32> to vector<2x8x8xf32>
    %285 = arith.addf %283, %284 : vector<2x8x8xf32>
    %cst_118 = arith.constant dense<0xFF800000> : vector<2x8xf32>
    %286 = vector.multi_reduction <maximumf>, %285, %cst_118 [2] : vector<2x8x8xf32> to vector<2x8xf32>
    %287 = vector.shape_cast %286 : vector<2x8xf32> to vector<2x8x1xf32>
    %288 = vector.broadcast %287 : vector<2x8x1xf32> to vector<2x8x8xf32>
    %289 = arith.subf %285, %288 : vector<2x8x8xf32>
    %290 = math.exp %289 : vector<2x8x8xf32>
    %cst_119 = arith.constant dense<0.000000e+00> : vector<2x8xf32>
    %291 = vector.multi_reduction <add>, %290, %cst_119 [2] : vector<2x8x8xf32> to vector<2x8xf32>
    %292 = vector.shape_cast %291 : vector<2x8xf32> to vector<2x8x1xf32>
    %293 = tpu.reciprocal %292 {approx = true} : vector<2x8x1xf32> -> vector<2x8x1xf32>
    %294 = vector.broadcast %293 : vector<2x8x1xf32> to vector<2x8x8xf32>
    %295 = arith.mulf %290, %294 : vector<2x8x8xf32>
    "tpu.trace_start"() <{level = 10 : i32, message = "bqk,bkd->bqd"}> : () -> ()
    %cst_120 = arith.constant dense<0.000000e+00> : vector<2x8x8xf32>
    %296 = tpu.matmul %295, %280, %cst_120 {dimension_numbers = #tpu.dot_dimension_numbers<[2], [1], [1], [2], [0, 0, 0, 1, 1, 2], [0], [0]>} : vector<2x8x8xf32>, vector<2x8x8xf32>, vector<2x8x8xf32> -> vector<2x8x8xf32>
    "tpu.trace_stop"() : () -> ()
    %297 = vector.shape_cast %296 : vector<2x8x8xf32> to vector<16x8xf32>
    %298 = vector.extract_strided_slice %230 {offsets = [16, 0], sizes = [8, 32], strides = [1, 1]} : vector<32x32xf32> to vector<8x32xf32>
    %cst_121 = arith.constant dense<0.000000e+00> : vector<16x32xf32>
    %299 = tpu.matmul %297, %298, %cst_121 {dimension_numbers = #tpu.dot_dimension_numbers<[1], [0], [0], [1], [0, 0, 1, 1], [], []>} : vector<16x8xf32>, vector<8x32xf32>, vector<16x32xf32> -> vector<16x32xf32>
    %300 = arith.addf %277, %299 : vector<16x32xf32>
    %301 = vector.extract_strided_slice %224 {offsets = [0, 0, 24], sizes = [2, 8, 8], strides = [1, 1, 1]} : vector<2x8x32xf32> to vector<2x8x8xf32>
    %302 = vector.extract_strided_slice %226 {offsets = [0, 0, 24], sizes = [2, 8, 8], strides = [1, 1, 1]} : vector<2x8x32xf32> to vector<2x8x8xf32>
    %303 = vector.extract_strided_slice %228 {offsets = [0, 0, 24], sizes = [2, 8, 8], strides = [1, 1, 1]} : vector<2x8x32xf32> to vector<2x8x8xf32>
    "tpu.trace_start"() <{level = 10 : i32, message = "bqd,bkd->bqk"}> : () -> ()
    %cst_122 = arith.constant dense<0.000000e+00> : vector<2x8x8xf32>
    %304 = tpu.matmul %301, %302, %cst_122 {dimension_numbers = #tpu.dot_dimension_numbers<[2], [2], [1], [1], [0, 0, 0, 1, 1, 1], [0], [0]>} : vector<2x8x8xf32>, vector<2x8x8xf32>, vector<2x8x8xf32> -> vector<2x8x8xf32>
    "tpu.trace_stop"() : () -> ()
    %cst_123 = arith.constant 0.353553385 : f32
    %305 = vector.broadcast %cst_123 : f32 to vector<2x8x8xf32>
    %306 = arith.mulf %304, %305 : vector<2x8x8xf32>
    %307 = vector.broadcast %6 : vector<2x1x8xf32> to vector<2x8x8xf32>
    %308 = arith.addf %306, %307 : vector<2x8x8xf32>
    %cst_124 = arith.constant dense<0xFF800000> : vector<2x8xf32>
    %309 = vector.multi_reduction <maximumf>, %308, %cst_124 [2] : vector<2x8x8xf32> to vector<2x8xf32>
    %310 = vector.shape_cast %309 : vector<2x8xf32> to vector<2x8x1xf32>
    %311 = vector.broadcast %310 : vector<2x8x1xf32> to vector<2x8x8xf32>
    %312 = arith.subf %308, %311 : vector<2x8x8xf32>
    %313 = math.exp %312 : vector<2x8x8xf32>
    %cst_125 = arith.constant dense<0.000000e+00> : vector<2x8xf32>
    %314 = vector.multi_reduction <add>, %313, %cst_125 [2] : vector<2x8x8xf32> to vector<2x8xf32>
    %315 = vector.shape_cast %314 : vector<2x8xf32> to vector<2x8x1xf32>
    %316 = tpu.reciprocal %315 {approx = true} : vector<2x8x1xf32> -> vector<2x8x1xf32>
    %317 = vector.broadcast %316 : vector<2x8x1xf32> to vector<2x8x8xf32>
    %318 = arith.mulf %313, %317 : vector<2x8x8xf32>
    "tpu.trace_start"() <{level = 10 : i32, message = "bqk,bkd->bqd"}> : () -> ()
    %cst_126 = arith.constant dense<0.000000e+00> : vector<2x8x8xf32>
    %319 = tpu.matmul %318, %303, %cst_126 {dimension_numbers = #tpu.dot_dimension_numbers<[2], [1], [1], [2], [0, 0, 0, 1, 1, 2], [0], [0]>} : vector<2x8x8xf32>, vector<2x8x8xf32>, vector<2x8x8xf32> -> vector<2x8x8xf32>
    "tpu.trace_stop"() : () -> ()
    %320 = vector.shape_cast %319 : vector<2x8x8xf32> to vector<16x8xf32>
    %321 = vector.extract_strided_slice %230 {offsets = [24, 0], sizes = [8, 32], strides = [1, 1]} : vector<32x32xf32> to vector<8x32xf32>
    %cst_127 = arith.constant dense<0.000000e+00> : vector<16x32xf32>
    %322 = tpu.matmul %320, %321, %cst_127 {dimension_numbers = #tpu.dot_dimension_numbers<[1], [0], [0], [1], [0, 0, 1, 1], [], []>} : vector<16x8xf32>, vector<8x32xf32>, vector<16x32xf32> -> vector<16x32xf32>
    %323 = arith.addf %300, %322 : vector<16x32xf32>
    %324 = arith.addf %189, %323 : vector<16x32xf32>
    %c1_128 = arith.constant 1 : index
    %c0_129 = arith.constant 0 : index
    %c0_130 = arith.constant 0 : index
    %325 = vector.load %arg9[%c1_128, %c0_129, %c0_130] : memref<2x1x32xf32, #tpu.memory_space<vmem>>, vector<1x1x32xf32>
    %326 = vector.shape_cast %325 : vector<1x1x32xf32> to vector<1x32xf32>
    %327 = vector.broadcast %326 : vector<1x32xf32> to vector<16x32xf32>
    %328 = arith.addf %324, %327 : vector<16x32xf32>
    %c1_131 = arith.constant 1 : index
    %c0_132 = arith.constant 0 : index
    %c0_133 = arith.constant 0 : index
    %329 = vector.load %arg10[%c1_131, %c0_132, %c0_133] : memref<2x1x32xf32, #tpu.memory_space<vmem>>, vector<1x1x32xf32>
    %330 = vector.shape_cast %329 : vector<1x1x32xf32> to vector<1x32xf32>
    %c1_134 = arith.constant 1 : index
    %c0_135 = arith.constant 0 : index
    %c0_136 = arith.constant 0 : index
    %331 = vector.load %arg11[%c1_134, %c0_135, %c0_136] : memref<2x1x32xf32, #tpu.memory_space<vmem>>, vector<1x1x32xf32>
    %332 = vector.shape_cast %331 : vector<1x1x32xf32> to vector<1x32xf32>
    %cst_137 = arith.constant dense<0.000000e+00> : vector<16xf32>
    %333 = vector.multi_reduction <add>, %328, %cst_137 [1] : vector<16x32xf32> to vector<16xf32>
    %334 = vector.shape_cast %333 : vector<16xf32> to vector<16x1xf32>
    %335 = arith.mulf %328, %328 : vector<16x32xf32>
    %cst_138 = arith.constant dense<0.000000e+00> : vector<16xf32>
    %336 = vector.multi_reduction <add>, %335, %cst_138 [1] : vector<16x32xf32> to vector<16xf32>
    %337 = vector.shape_cast %336 : vector<16xf32> to vector<16x1xf32>
    %cst_139 = arith.constant 3.125000e-02 : f32
    %338 = vector.broadcast %cst_139 : f32 to vector<16x1xf32>
    %339 = arith.mulf %334, %338 : vector<16x1xf32>
    %cst_140 = arith.constant 3.125000e-02 : f32
    %340 = vector.broadcast %cst_140 : f32 to vector<16x1xf32>
    %341 = arith.mulf %337, %340 : vector<16x1xf32>
    %342 = arith.mulf %339, %339 : vector<16x1xf32>
    %343 = arith.subf %341, %342 : vector<16x1xf32>
    %344 = vector.broadcast %339 : vector<16x1xf32> to vector<16x32xf32>
    %345 = arith.subf %328, %344 : vector<16x32xf32>
    %cst_141 = arith.constant 9.99999974E-6 : f32
    %346 = vector.broadcast %cst_141 : f32 to vector<16x1xf32>
    %347 = arith.addf %343, %346 : vector<16x1xf32>
    %348 = math.rsqrt %347 : vector<16x1xf32>
    %349 = vector.broadcast %348 : vector<16x1xf32> to vector<16x32xf32>
    %350 = arith.mulf %345, %349 : vector<16x32xf32>
    %351 = vector.broadcast %330 : vector<1x32xf32> to vector<16x32xf32>
    %352 = arith.mulf %350, %351 : vector<16x32xf32>
    %353 = vector.broadcast %332 : vector<1x32xf32> to vector<16x32xf32>
    %354 = arith.addf %352, %353 : vector<16x32xf32>
    %c1_142 = arith.constant 1 : index
    %c0_143 = arith.constant 0 : index
    %c0_144 = arith.constant 0 : index
    %355 = vector.load %arg12[%c1_142, %c0_143, %c0_144] : memref<2x32x64xf32, #tpu.memory_space<vmem>>, vector<1x32x64xf32>
    %356 = vector.shape_cast %355 : vector<1x32x64xf32> to vector<32x64xf32>
    %cst_145 = arith.constant dense<0.000000e+00> : vector<16x64xf32>
    %357 = tpu.matmul %354, %356, %cst_145 {dimension_numbers = #tpu.dot_dimension_numbers<[1], [0], [0], [1], [0, 0, 1, 1], [], []>} : vector<16x32xf32>, vector<32x64xf32>, vector<16x64xf32> -> vector<16x64xf32>
    %c1_146 = arith.constant 1 : index
    %c0_147 = arith.constant 0 : index
    %c0_148 = arith.constant 0 : index
    %358 = vector.load %arg13[%c1_146, %c0_147, %c0_148] : memref<2x1x64xf32, #tpu.memory_space<vmem>>, vector<1x1x64xf32>
    %359 = vector.shape_cast %358 : vector<1x1x64xf32> to vector<1x64xf32>
    %360 = vector.broadcast %359 : vector<1x64xf32> to vector<16x64xf32>
    %361 = arith.addf %357, %360 : vector<16x64xf32>
    %cst_149 = arith.constant 0.000000e+00 : f32
    %362 = vector.broadcast %cst_149 : f32 to vector<16x64xf32>
    %363 = arith.maximumf %361, %362 : vector<16x64xf32>
    %c1_150 = arith.constant 1 : index
    %c0_151 = arith.constant 0 : index
    %c0_152 = arith.constant 0 : index
    %364 = vector.load %arg14[%c1_150, %c0_151, %c0_152] : memref<2x64x32xf32, #tpu.memory_space<vmem>>, vector<1x64x32xf32>
    %365 = vector.shape_cast %364 : vector<1x64x32xf32> to vector<64x32xf32>
    %cst_153 = arith.constant dense<0.000000e+00> : vector<16x32xf32>
    %366 = tpu.matmul %363, %365, %cst_153 {dimension_numbers = #tpu.dot_dimension_numbers<[1], [0], [0], [1], [0, 0, 1, 1], [], []>} : vector<16x64xf32>, vector<64x32xf32>, vector<16x32xf32> -> vector<16x32xf32>
    %c1_154 = arith.constant 1 : index
    %c0_155 = arith.constant 0 : index
    %c0_156 = arith.constant 0 : index
    %367 = vector.load %arg15[%c1_154, %c0_155, %c0_156] : memref<2x1x32xf32, #tpu.memory_space<vmem>>, vector<1x1x32xf32>
    %368 = vector.shape_cast %367 : vector<1x1x32xf32> to vector<1x32xf32>
    %369 = vector.broadcast %368 : vector<1x32xf32> to vector<16x32xf32>
    %370 = arith.addf %366, %369 : vector<16x32xf32>
    %371 = arith.addf %328, %370 : vector<16x32xf32>
    %c0_157 = arith.constant 0 : index
    %c0_158 = arith.constant 0 : index
    %372 = vector.load %arg16[%c0_157, %c0_158] : memref<1x32xf32, #tpu.memory_space<vmem>>, vector<1x32xf32>
    %c0_159 = arith.constant 0 : index
    %c0_160 = arith.constant 0 : index
    %373 = vector.load %arg17[%c0_159, %c0_160] : memref<1x32xf32, #tpu.memory_space<vmem>>, vector<1x32xf32>
    %cst_161 = arith.constant dense<0.000000e+00> : vector<16xf32>
    %374 = vector.multi_reduction <add>, %371, %cst_161 [1] : vector<16x32xf32> to vector<16xf32>
    %375 = vector.shape_cast %374 : vector<16xf32> to vector<16x1xf32>
    %376 = arith.mulf %371, %371 : vector<16x32xf32>
    %cst_162 = arith.constant dense<0.000000e+00> : vector<16xf32>
    %377 = vector.multi_reduction <add>, %376, %cst_162 [1] : vector<16x32xf32> to vector<16xf32>
    %378 = vector.shape_cast %377 : vector<16xf32> to vector<16x1xf32>
    %cst_163 = arith.constant 3.125000e-02 : f32
    %379 = vector.broadcast %cst_163 : f32 to vector<16x1xf32>
    %380 = arith.mulf %375, %379 : vector<16x1xf32>
    %cst_164 = arith.constant 3.125000e-02 : f32
    %381 = vector.broadcast %cst_164 : f32 to vector<16x1xf32>
    %382 = arith.mulf %378, %381 : vector<16x1xf32>
    %383 = arith.mulf %380, %380 : vector<16x1xf32>
    %384 = arith.subf %382, %383 : vector<16x1xf32>
    %385 = vector.broadcast %380 : vector<16x1xf32> to vector<16x32xf32>
    %386 = arith.subf %371, %385 : vector<16x32xf32>
    %cst_165 = arith.constant 9.99999974E-6 : f32
    %387 = vector.broadcast %cst_165 : f32 to vector<16x1xf32>
    %388 = arith.addf %384, %387 : vector<16x1xf32>
    %389 = math.rsqrt %388 : vector<16x1xf32>
    %390 = vector.broadcast %389 : vector<16x1xf32> to vector<16x32xf32>
    %391 = arith.mulf %386, %390 : vector<16x32xf32>
    %392 = vector.broadcast %372 : vector<1x32xf32> to vector<16x32xf32>
    %393 = arith.mulf %391, %392 : vector<16x32xf32>
    %394 = vector.broadcast %373 : vector<1x32xf32> to vector<16x32xf32>
    %395 = arith.addf %393, %394 : vector<16x32xf32>
    %396 = vector.shape_cast %395 : vector<16x32xf32> to vector<2x8x32xf32>
    %c0_166 = arith.constant 0 : index
    %c0_167 = arith.constant 0 : index
    %c0_168 = arith.constant 0 : index
    %397 = vector.load %arg18[%c0_166, %c0_167, %c0_168] : memref<2x8x32xf32, #tpu.memory_space<vmem>>, vector<2x8x32xf32>
    tpu.vector_store %arg18[%c0_166, %c0_167, %c0_168], %396 {strides = array<i32>} : memref<2x8x32xf32, #tpu.memory_space<vmem>>, vector<2x8x32xf32>,
    return
  }
  func.func @transform_0(%arg0: i32) -> (i32, i32, i32) {
    %c0_i32 = arith.constant 0 : i32
    %c0_i32_0 = arith.constant 0 : i32
    %c0_i32_1 = arith.constant 0 : i32
    return %arg0, %c0_i32, %c0_i32_0 : i32, i32, i32
  }
  func.func @transform_1(%arg0: i32) -> (i32, i32, i32) {
    %c0_i32 = arith.constant 0 : i32
    %c0_i32_0 = arith.constant 0 : i32
    %c0_i32_1 = arith.constant 0 : i32
    return %arg0, %c0_i32, %c0_i32_0 : i32, i32, i32
  }
  func.func @transform_2(%arg0: i32) -> (i32, i32, i32) {
    %c0_i32 = arith.constant 0 : i32
    %c0_i32_0 = arith.constant 0 : i32
    %c0_i32_1 = arith.constant 0 : i32
    %c0_i32_2 = arith.constant 0 : i32
    return %c0_i32, %c0_i32_0, %c0_i32_1 : i32, i32, i32
  }
  func.func @transform_3(%arg0: i32) -> (i32, i32, i32) {
    %c0_i32 = arith.constant 0 : i32
    %c0_i32_0 = arith.constant 0 : i32
    %c0_i32_1 = arith.constant 0 : i32
    %c0_i32_2 = arith.constant 0 : i32
    return %c0_i32, %c0_i32_0, %c0_i32_1 : i32, i32, i32
  }
  func.func @transform_4(%arg0: i32) -> (i32, i32, i32) {
    %c0_i32 = arith.constant 0 : i32
    %c0_i32_0 = arith.constant 0 : i32
    %c0_i32_1 = arith.constant 0 : i32
    %c0_i32_2 = arith.constant 0 : i32
    return %c0_i32, %c0_i32_0, %c0_i32_1 : i32, i32, i32
  }
  func.func @transform_5(%arg0: i32) -> (i32, i32, i32) {
    %c0_i32 = arith.constant 0 : i32
    %c0_i32_0 = arith.constant 0 : i32
    %c0_i32_1 = arith.constant 0 : i32
    %c0_i32_2 = arith.constant 0 : i32
    return %c0_i32, %c0_i32_0, %c0_i32_1 : i32, i32, i32
  }
  func.func @transform_6(%arg0: i32) -> (i32, i32, i32) {
    %c0_i32 = arith.constant 0 : i32
    %c0_i32_0 = arith.constant 0 : i32
    %c0_i32_1 = arith.constant 0 : i32
    %c0_i32_2 = arith.constant 0 : i32
    return %c0_i32, %c0_i32_0, %c0_i32_1 : i32, i32, i32
  }
  func.func @transform_7(%arg0: i32) -> (i32, i32, i32) {
    %c0_i32 = arith.constant 0 : i32
    %c0_i32_0 = arith.constant 0 : i32
    %c0_i32_1 = arith.constant 0 : i32
    %c0_i32_2 = arith.constant 0 : i32
    return %c0_i32, %c0_i32_0, %c0_i32_1 : i32, i32, i32
  }
  func.func @transform_8(%arg0: i32) -> (i32, i32, i32) {
    %c0_i32 = arith.constant 0 : i32
    %c0_i32_0 = arith.constant 0 : i32
    %c0_i32_1 = arith.constant 0 : i32
    %c0_i32_2 = arith.constant 0 : i32
    return %c0_i32, %c0_i32_0, %c0_i32_1 : i32, i32, i32
  }
  func.func @transform_9(%arg0: i32) -> (i32, i32, i32) {
    %c0_i32 = arith.constant 0 : i32
    %c0_i32_0 = arith.constant 0 : i32
    %c0_i32_1 = arith.constant 0 : i32
    %c0_i32_2 = arith.constant 0 : i32
    return %c0_i32, %c0_i32_0, %c0_i32_1 : i32, i32, i32
  }
  func.func @transform_10(%arg0: i32) -> (i32, i32, i32) {
    %c0_i32 = arith.constant 0 : i32
    %c0_i32_0 = arith.constant 0 : i32
    %c0_i32_1 = arith.constant 0 : i32
    %c0_i32_2 = arith.constant 0 : i32
    return %c0_i32, %c0_i32_0, %c0_i32_1 : i32, i32, i32
  }
  func.func @transform_11(%arg0: i32) -> (i32, i32, i32) {
    %c0_i32 = arith.constant 0 : i32
    %c0_i32_0 = arith.constant 0 : i32
    %c0_i32_1 = arith.constant 0 : i32
    %c0_i32_2 = arith.constant 0 : i32
    return %c0_i32, %c0_i32_0, %c0_i32_1 : i32, i32, i32
  }
  func.func @transform_12(%arg0: i32) -> (i32, i32, i32) {
    %c0_i32 = arith.constant 0 : i32
    %c0_i32_0 = arith.constant 0 : i32
    %c0_i32_1 = arith.constant 0 : i32
    %c0_i32_2 = arith.constant 0 : i32
    return %c0_i32, %c0_i32_0, %c0_i32_1 : i32, i32, i32
  }
  func.func @transform_13(%arg0: i32) -> (i32, i32, i32) {
    %c0_i32 = arith.constant 0 : i32
    %c0_i32_0 = arith.constant 0 : i32
    %c0_i32_1 = arith.constant 0 : i32
    %c0_i32_2 = arith.constant 0 : i32
    return %c0_i32, %c0_i32_0, %c0_i32_1 : i32, i32, i32
  }
  func.func @transform_14(%arg0: i32) -> (i32, i32, i32) {
    %c0_i32 = arith.constant 0 : i32
    %c0_i32_0 = arith.constant 0 : i32
    %c0_i32_1 = arith.constant 0 : i32
    %c0_i32_2 = arith.constant 0 : i32
    return %c0_i32, %c0_i32_0, %c0_i32_1 : i32, i32, i32
  }
  func.func @transform_15(%arg0: i32) -> (i32, i32) {
    %c0_i32 = arith.constant 0 : i32
    %c0_i32_0 = arith.constant 0 : i32
    %c0_i32_1 = arith.constant 0 : i32
    return %c0_i32, %c0_i32_0 : i32, i32
  }
  func.func @transform_16(%arg0: i32) -> (i32, i32) {
    %c0_i32 = arith.constant 0 : i32
    %c0_i32_0 = arith.constant 0 : i32
    %c0_i32_1 = arith.constant 0 : i32
    return %c0_i32, %c0_i32_0 : i32, i32
  }
  func.func @transform_17(%arg0: i32) -> (i32, i32, i32) {
    %c0_i32 = arith.constant 0 : i32
    %c0_i32_0 = arith.constant 0 : i32
    %c0_i32_1 = arith.constant 0 : i32
    return %arg0, %c0_i32, %c0_i32_0 : i32, i32, i32
  }
}

</mosaic_0001>

<bundles_post_ra>
// kernel: tpu_custom_call.1
= control target key start
LH: loop header
LB: loop body
LE: loop exit
PB: predicated region body
PF: predicated region fallthrough
CT: control target
= control target key end

     0   :  { %s5770_s0 = inlined_call_operand.hbm [shape: f32[2,8,32], index: 0, kind: input, shape index: {}]   ;;  %s5771_s1 = inlined_call_operand.hbm [shape: f32[2,1,8], index: 1, kind: input, shape index: {}]   ;;  %s5772_s2 = inlined_call_operand.hbm [shape: f32[1,8,32], index: 2, kind: input, shape index: {}]   ;;  %s5773_s3 = inlined_call_operand.vmem [shape: f32[2,1,32], index: 3, kind: input, shape index: {}]   ;;  %s5774_s4 = inlined_call_operand.vmem [shape: f32[2,1,32], index: 4, kind: input, shape index: {}]   ;;  %s5775_s5 = inlined_call_operand.vmem [shape: f32[2,32,96], index: 5, kind: input, shape index: {}]   ;;  %s5776_s6 = inlined_call_operand.vmem [shape: f32[2,1,96], index: 6, kind: input, shape index: {}]   ;;  %s5777_s7 = inlined_call_operand.vmem [shape: f32[2,32,32], index: 7, kind: input, shape index: {}]   ;;  %s5778_s8 = inlined_call_operand.vmem [shape: f32[2,1,32], index: 8, kind: input, shape index: {}]   ;;  %s5779_s9 = inlined_call_operand.vmem [shape: f32[2,1,32], index: 9, kind: input, shape index: {}]   ;;  %s5780_s10 = inlined_call_operand.vmem [shape: f32[2,1,32], index: 10, kind: input, shape index: {}]   ;;  %s5781_s11 = inlined_call_operand.vmem [shape: f32[2,32,64], index: 11, kind: input, shape index: {}]   ;;  %s5782_s12 = inlined_call_operand.vmem [shape: f32[2,1,64], index: 12, kind: input, shape index: {}]   ;;  %s5783_s13 = inlined_call_operand.vmem [shape: f32[2,64,32], index: 13, kind: input, shape index: {}]   ;;  %s5784_s14 = inlined_call_operand.vmem [shape: f32[2,1,32], index: 14, kind: input, shape index: {}]   ;;  %s5785_s15 = inlined_call_operand.vmem [shape: f32[1,32], index: 15, kind: input, shape index: {}]   ;;  %s5786_s16 = inlined_call_operand.vmem [shape: f32[1,32], index: 16, kind: input, shape index: {}]   ;;  %s5787_s17 = inlined_call_operand.hbm [shape: f32[2,8,32], index: 17, kind: output, shape index: {}]  }
   0x1   :  { %5796 = sst [smem:[#allocation12_spill]] %s5770_s0 }
   0x2   :  { %5797 = sst [smem:[#allocation13_spill]] %s5771_s1 }
   0x3   :  { %22 = vsyncpa [#allocation3], 0 }
   0x4   :  { %23 = vsyncpa [#allocation6], 0 }
   0x5   :  { %24 = vsyncpa [#allocation4], 0  ;;  %s5041_s24 = smov [#allocation5]  }
   0x6   :  { %s42_s25 = sshll.u32 %s5041_s24, 4  ;;  %s43_s25 = int_to_ptr.vmem [resolvable:$true] %s42_s25 }
   0x7   :  { %s4963_s26 = scalar_lea.vmem %s43_s25, 32  ;;  %p4968_p1 = scmp.lt.s32.totalorder %s43_s25, %s43_s25 }
   0x8   :  { %p4964_p0 = scmp.ne.s32.totalorder %s43_s25, %s4963_s26  ;;  %p4969_p2 = scmp.lt.s32.totalorder %s4963_s26, %s4963_s26 }
   0xa   :  { %p4970_p3 = por %p4969_p2, %p4968_p1 }
   0xc   :  { %p4971_p4 = pnand %p4970_p3, %p4964_p0 }
   0xe   :  { %4974 = shalt.err (!%p4971_p4)
}
   0xf   :  { %s5042_s27 = smov 16   ;;  %s5043_s28 = smov 1  }
  0x10   :  { %s5798_s30 = sld [smem:[#allocation13_spill]]  ;;  %s5044_s18 = smov [#allocation2]  }
  0x11   :  { %s30_s19 = sshll.u32 %s5044_s18, 4  ;;  %s31_s19 = int_to_ptr.vmem [resolvable:$true] %s30_s19 }
  0x12   :  { %s4983_s1 = scalar_lea.vmem %s31_s19, 256  ;;  %p4988_p6 = scmp.lt.s32.totalorder %s31_s19, %s31_s19 }
  0x13   :  { %p4984_p5 = scmp.ne.s32.totalorder %s31_s19, %s4983_s1  ;;  %p4989_p7 = scmp.lt.s32.totalorder %s4983_s1, %s4983_s1 }
  0x15   :  { %p4990_p8 = por %p4989_p7, %p4988_p6 }
  0x16   :  { %48 = dma.hbm_to_vmem [thread:$0]  %s5798_s30, 32, %s43_s25, [#allocation6], %s5042_s27, %s5042_s27, %s5043_s28  }
  0x17   :  { %p4991_p9 = pnand %p4990_p8, %p4984_p5 }
  0x19   :  { %4994 = shalt.err (!%p4991_p9)
}
  0x1a   :  { %s5788_s20 = smov 128   ;;  %s5789_s21 = smov 8  }
  0x1b   :  { %s5799_s24 = sld [smem:[#allocation12_spill]]  ;;  %s5047_s25 = smov [#allocation7]  }
  0x1c   :  { %s55_s26 = sshll.u32 %s5047_s25, 4  ;;  %s56_s26 = int_to_ptr.vmem [resolvable:$true] %s55_s26 }
  0x1d   :  { %s5003_s27 = scalar_lea.vmem %s56_s26, 128  ;;  %p5008_p11 = scmp.lt.s32.totalorder %s56_s26, %s56_s26 }
  0x1e   :  { %p5004_p10 = scmp.ne.s32.totalorder %s56_s26, %s5003_s27  ;;  %p5009_p12 = scmp.lt.s32.totalorder %s5003_s27, %s5003_s27 }
  0x20   :  { %p5010_p13 = por %p5009_p12, %p5008_p11 }
  0x21   :  { %36 = dma.hbm_to_vmem [thread:$0]  %s5799_s24, 256, %s31_s19, [#allocation3], %s5788_s20, %s5788_s20, %s5789_s21  }
  0x22   :  { %p5011_p0 = pnand %p5010_p13, %p5004_p10 }
  0x24   :  { %5014 = shalt.err (!%p5011_p0)
}
  0x25   :  { %58 = dma.hbm_to_vmem [thread:$0]  %s5772_s2, 128, %s56_s26, [#allocation6]  }
  0x26   :  { %5035 = dma.done.wait [#allocation3], 256  }
  0x27   :  { %5036 = vsyncadd [#allocation3], 4294967040 }
  0x28   :  { %5037 = dma.done.wait [#allocation6], 160  }
  0x29   :  { %5038 = vsyncadd [#allocation6], 4294967136  ;;  %v96_v0 = vld [vmem:[#allocation2] sm:$0xff]  ;;  %v98_v1 = vld [vmem:[#allocation7] sm:$0xff]  ;;  %vm107_vm0 = vcmask 261120   ;;  %v5048_v41 = vmov 0.0   ;;  %v409_v49 = vlaneseq }
  0x2a   :  { %v97_v2 = vld [vmem:[#allocation2 + $0x8] sm:$0xff]  ;;  %v5164_v3 = vadd.f32 %v98_v1, %v96_v0  ;;  %v157_v11 = vld [vmem:[%s5775_s5 + $0x18] sm:$0xff]  ;;  %v156_v12 = vld [vmem:[%s5775_s5 + $0x10] sm:$0xff]  ;;  %4584 = vmatprep.subr.mxu1 %v5048_v41  ;;  %vm5049_vm1 = vmmov 0   ;;  %s5050_s2 = smov 96   ;;  %vm253_vm2 = vcmask 64512  }
  0x2b   :  { %v5166_v4 = vadd.f32 %v98_v1, %v97_v2  ;;  %4568 = vmatprep.subr.mxu0 %v157_v11  ;;  %v155_v13 = vld [vmem:[%s5775_s5 + $0x8] sm:$0xff]  ;;  %v154_v14 = vld [vmem:[%s5775_s5] sm:$0xff]  ;;  %4586 = vmatprep.mubr.msk.f32.mxu1 %vm5049_vm1, %v5048_v41  ;;  %v410_v50 = vshrl.u32 %v409_v49, 7  ;;  %v102_v51 = vld [vmem:[#allocation5 + $0x1] sm:$0x1]  ;;  %s5051_s0 = smov 64  }
  0x2c   :  { %v108_v5 = vsel %vm107_vm0, %v5164_v3, 0.0  ;;  %v114_v6 = vmul.f32 %v5164_v3, %v5164_v3  ;;  %4569 = vmatpush3.msra.mxu0 %v157_v11  ;;  %v4314_v31 = vld [vmem:[%s5773_s3] ss:$0 sm:$0xff]  ;;  %v101_v52 = vld [vmem:[#allocation5] sm:$0x1]  ;;  %s5052_s30 = smov 88  }
  0x2d   :  { %v115_v7 = vmul.f32 %v5166_v4, %v5166_v4  ;;  %109 = vadd.xlane.f32.xlu0 %v108_v5  ;;  %v111_v9 = vsel %vm107_vm0, %v5166_v4, 0.0  ;;  %4570 = vmatprep.subr.mxu0 %v156_v12  ;;  %v4315_v33 = vld [vmem:[%s5774_s4] ss:$0 sm:$0xff]  ;;  %v104_v53 = vmul.f32 -1e+09, %v102_v51  ;;  %v411_v54 = vsub.s32 0, %v410_v50 }
  0x2e   :  { %v116_v8 = vsel %vm107_vm0, %v114_v6, 0.0  ;;  %4571 = vmatpush3.msra.mxu0 %v156_v12  ;;  %v4316_v42 = vld [vmem:[%s5776_s6] ss:$0 sm:$0xff]  ;;  %v103_v55 = vmul.f32 -1e+09, %v101_v52  ;;  %s5053_s18 = smov 120  }
  0x2f   :  { %117 = vadd.xlane.f32.xlu1 %v116_v8  ;;  %v119_v10 = vsel %vm107_vm0, %v115_v7, 0.0  ;;  %4572 = vmatprep.subr.mxu0 %v155_v13  ;;  %v5229_v56 = vrot.slane %v104_v53, %v411_v54  ;;  %s5054_s19 = smov 56   ;;  %s5055_s1 = smov 80   ;;  %vm2093_vm3 = vcmask 523264  }
  0x30   :  { %4573 = vmatpush3.msra.mxu0 %v155_v13  ;;  %v5231_v59 = vrot.slane %v103_v55, %v411_v54  ;;  %s5056_s22 = smov 112   ;;  %s5057_s27 = smov 48  }
  0x31   :  { %112 = vadd.xlane.f32.xlu0 %v111_v9  ;;  %4574 = vmatprep.subr.mxu0 %v154_v14  ;;  %s5794_s28 = smov 72   ;;  %s5792_s29 = smov 104  }
  0x32   :  { %4575 = vmatpush3.msra.mxu0 %v154_v14  ;;  %s5790_s25 = smov 40  }
  0x33   :  { %120 = vadd.xlane.f32.xlu1 %v119_v10  ;;  %4579 = vmatprep.subr.mxu0 %v5048_v41 }
  0xb6   :  { %v110_v15 = vpop.xlane.xlu0 %109 }
  0xb7   :  { %v122_v16 = vmul.f32 0.03125, %v110_v15 }
  0xb8   :  { %v118_v17 = vpop.xlane.xlu1 %117 }
  0xb9   :  { %v126_v18 = vmul.f32 %v122_v16, %v122_v16  ;;  %v124_v19 = vmul.f32 0.03125, %v118_v17  ;;  %v130_v29 = vsub.f32 %v5164_v3, %v122_v16 }
  0xba   :  { %v113_v20 = vpop.xlane.xlu0 %112 }
  0xbb   :  { %v128_v21 = vsub.f32 %v124_v19, %v126_v18  ;;  %v123_v22 = vmul.f32 0.03125, %v113_v20 }
  0xbc   :  { %v121_v23 = vpop.xlane.xlu1 %120 }
  0xbd   :  { %v132_v24 = vadd.f32 1e-05, %v128_v21  ;;  %v127_v25 = vmul.f32 %v123_v22, %v123_v22  ;;  %v125_v26 = vmul.f32 0.03125, %v121_v23  ;;  %v131_v34 = vsub.f32 %v5166_v4, %v123_v22 }
  0xbf   :  { %4871 = vrsqrt.f32 %v132_v24  ;;  %v129_v27 = vsub.f32 %v125_v26, %v127_v25 }
  0xc1   :  { %v133_v28 = vadd.f32 1e-05, %v129_v27 }
  0xc3   :  { %4873 = vrsqrt.f32 %v133_v28 }
  0xcc   :  { %v4872_v30 = vpop.eup %4871 }
  0xcd   :  { %v136_v32 = vmul.f32 %v4872_v30, %v130_v29 }
  0xcf   :  { %v144_v35 = vmul.f32 %v4314_v31, %v136_v32 }
  0xd0   :  { %v4874_v36 = vpop.eup %4873 }
  0xd1   :  { %v137_v37 = vmul.f32 %v4874_v36, %v131_v34  ;;  %v152_v38 = vadd.f32 %v4315_v33, %v144_v35 }
  0xd3   :  { %v145_v39 = vmul.f32 %v4314_v31, %v137_v37  ;;  %4576 = vmatprep.mubr.msk.f32.mxu0 %vm107_vm0, %v152_v38 }
  0xd5   :  { %v153_v40 = vadd.f32 %v4315_v33, %v145_v39 }
  0xd7   :  { %4577 = vmatmul.mubr.msk.f32.vlgmr.msra.gmra.mxu0 %vm107_vm0, %v153_v40 }
  0xd8   :  { %4581 = vmatprep.mubr.msk.f32.mxu0 %vm5049_vm1, %v5048_v41 }
 0x197   :  { %v4578_v43 = vpop.f32.mrf.mxu0 }
 0x198   :  { %v5209_v44 = vadd.f32 %v4578_v43, %v4316_v42 }
 0x199   :  { %v237_v45 = vpop.f32.mrf.mxu0 }
 0x19a   :  { %v5211_v46 = vadd.f32 %v4316_v42, %v237_v45  ;;  %329 = vrot.lane.b32.xlu1 %v5209_v44, %s5050_s2 }
 0x19c   :  { %251 = vrot.lane.b32.xlu0 %v5211_v46, %s5050_s2 }
 0x20c   :  { %v330_v47 = vpop.permute.xlu1 %329 }
 0x20d   :  { %4585 = vmatpush3.xpose.msk.msra.mxu1 %vm253_vm2, %v330_v47 }
 0x20e   :  { %v252_v48 = vpop.permute.xlu0 %251  ;;  %4594 = vmatprep.subr.mxu1 %v5048_v41 }
 0x20f   :  { %4580 = vmatpush3.xpose.msk.msra.mxu0 %vm253_vm2, %v252_v48 }
 0x210   :  { %4587 = vmatmul.mubr.msk.f32.vlgmr.msra.gmra.mxu1 %vm253_vm2, %v5209_v44  ;;  %4589 = vmatprep.subr.mxu0 %v5048_v41 }
 0x211   :  { %4596 = vmatprep.mubr.msk.f32.mxu1 %vm5049_vm1, %v5048_v41 }
 0x212   :  { %4582 = vmatmul.mubr.msk.f32.vlgmr.msra.gmra.mxu0 %vm253_vm2, %v5211_v46 }
 0x213   :  { %4591 = vmatprep.mubr.msk.f32.mxu0 %vm5049_vm1, %v5048_v41 }
 0x2d0   :  { %v401_v57 = vpop.f32.mrf.mxu1 }
 0x2d1   :  { %v406_v58 = vmul.f32 0.35355338, %v401_v57  ;;  %v246_v57 = vld [vmem:[%s5777_s7] sm:$0xff] }
 0x2d2   :  { %v324_v60 = vpop.f32.mrf.mxu0  ;;  %v4588_v61 = vpop.f32.mrf.mxu1 }
 0x2d3   :  { %v405_v62 = vmul.f32 0.35355338, %v324_v60  ;;  %v420_v63 = vadd.f32 %v5229_v56, %v406_v58 }
 0x2d4   :  { %v4583_v0 = vpop.f32.mrf.mxu0 }
 0x2d5   :  { %v424_v1 = vsel %vm253_vm2, %v420_v63, -inf  ;;  %v419_v2 = vadd.f32 %v5231_v59, %v405_v62 }
 0x2d6   :  { %425 = vmax.xlane.f32.xlu0 %v424_v1 }
 0x2d7   :  { %v421_v5 = vsel %vm253_vm2, %v419_v2, -inf }
 0x2d8   :  { %422 = vmax.xlane.f32.xlu1 %v421_v5 }
 0x35f   :  { %v426_v6 = vpop.xlane.xlu0 %425 }
 0x360   :  { %v428_v7 = vsub.f32 %v420_v63, %v426_v6 }
 0x361   :  { %v423_v8 = vpop.xlane.xlu1 %422 }
 0x362   :  { %v431_v9 = vmul.f32 1.442695, %v428_v7  ;;  %v427_v10 = vsub.f32 %v419_v2, %v423_v8  ;;  %v247_v7 = vld [vmem:[%s5777_s7 + $0x8] sm:$0xff] }
 0x364   :  { %4875 = vpow2.f32 %v431_v9  ;;  %v429_v11 = vmul.f32 1.442695, %v427_v10 }
 0x366   :  { %4877 = vpow2.f32 %v429_v11 }
 0x371   :  { %v4876_v12 = vpop.eup %4875 }
 0x372   :  { %v436_v13 = vsel %vm253_vm2, %v4876_v12, 0.0 }
 0x373   :  { %v4878_v14 = vpop.eup %4877  ;;  %437 = vadd.xlane.f32.xlu1 %v436_v13 }
 0x374   :  { %v433_v15 = vsel %vm253_vm2, %v4878_v14, 0.0 }
 0x375   :  { %434 = vadd.xlane.f32.xlu0 %v433_v15 }
 0x384   :  { %519 = vrot.lane.b32.xlu1 %v5209_v44, %s5051_s0 }
 0x388   :  { %597 = vrot.lane.b32.xlu1 %v5211_v46, %s5052_s30 }
 0x38b   :  { %443 = vrot.lane.b32.xlu0 %v5211_v46, %s5051_s0 }
 0x38c   :  { %675 = vrot.lane.b32.xlu1 %v5209_v44, %s5052_s30 }
 0x38f   :  { %595 = vrot.lane.b32.xlu0 %v5211_v46, %s5053_s18 }
 0x390   :  { %673 = vrot.lane.b32.xlu1 %v5209_v44, %s5053_s18 }
 0x3fc   :  { %v438_v16 = vpop.xlane.xlu1 %437 }
 0x3fd   :  { %4879 = vrcp.f32 %v438_v16 }
 0x3fe   :  { %v435_v17 = vpop.xlane.xlu0 %434 }
 0x3ff   :  { %4881 = vrcp.f32 %v435_v17 }
 0x400   :  { %v520_v18 = vpop.permute.xlu1 %519 }
 0x401   :  { %4595 = vmatpush3.msra.mxu1 %v520_v18 }
 0x402   :  { %v444_v19 = vpop.permute.xlu0 %443  ;;  %4604 = vmatprep.subr.mxu1 %v5048_v41 }
 0x403   :  { %4590 = vmatpush3.msra.mxu0 %v444_v19 }
 0x404   :  { %v598_v20 = vpop.permute.xlu1 %597  ;;  %4599 = vmatprep.subr.mxu0 %v5048_v41 }
 0x406   :  { %v596_v27 = vpop.permute.xlu0 %595 }
 0x408   :  { %v676_v22 = vpop.permute.xlu1 %675 }
 0x40a   :  { %v4880_v21 = vpop.eup %4879 }
 0x40b   :  { %v442_v23 = vmul.f32 %v4880_v21, %v4876_v12 }
 0x40c   :  { %v4882_v24 = vpop.eup %4881  ;;  %v674_v26 = vpop.permute.xlu1 %673 }
 0x40d   :  { %4597 = vmatmul.mubr.msk.f32.vlgmr.msra.gmra.mxu1 %vm253_vm2, %v442_v23  ;;  %v441_v25 = vmul.f32 %v4882_v24, %v4878_v14 }
 0x40e   :  { %4605 = vmatpush3.xpose.msk.msra.mxu1 %vm253_vm2, %v676_v22  ;;  %4606 = vmatprep.mubr.msk.f32.mxu1 %vm5049_vm1, %v5048_v41 }
 0x40f   :  { %4592 = vmatmul.mubr.msk.f32.vlgmr.msra.gmra.mxu0 %vm253_vm2, %v441_v25  ;;  %4614 = vmatprep.subr.mxu1 %v5048_v41 }
 0x410   :  { %4600 = vmatpush3.xpose.msk.msra.mxu0 %vm253_vm2, %v598_v20  ;;  %4601 = vmatprep.mubr.msk.f32.mxu0 %vm5049_vm1, %v5048_v41 }
 0x411   :  { %4607 = vmatmul.mubr.msk.f32.vlgmr.msra.gmra.mxu1 %vm253_vm2, %v674_v26  ;;  %4609 = vmatprep.subr.mxu0 %v5048_v41 }
 0x412   :  { %4616 = vmatprep.mubr.msk.f32.mxu1 %vm5049_vm1, %v5048_v41 }
 0x413   :  { %4602 = vmatmul.mubr.msk.f32.vlgmr.msra.gmra.mxu0 %vm253_vm2, %v596_v27 }
 0x414   :  { %4611 = vmatprep.mubr.msk.f32.mxu0 %vm5049_vm1, %v5048_v41 }
 0x4cd   :  { %v591_v28 = vpop.f32.mrf.mxu1 }
 0x4cf   :  { %v515_v29 = vpop.f32.mrf.mxu0  ;;  %v4598_v30 = vpop.f32.mrf.mxu1 }
 0x4d1   :  { %v4593_v31 = vpop.f32.mrf.mxu0  ;;  %v747_v32 = vpop.f32.mrf.mxu1 }
 0x4d2   :  { %v752_v33 = vmul.f32 0.35355338, %v747_v32 }
 0x4d3   :  { %v669_v34 = vpop.f32.mrf.mxu0  ;;  %v4608_v35 = vpop.f32.mrf.mxu1 }
 0x4d4   :  { %v751_v36 = vmul.f32 0.35355338, %v669_v34  ;;  %v754_v37 = vadd.f32 %v752_v33, %v5229_v56 }
 0x4d5   :  { %v4603_v38 = vpop.f32.mrf.mxu0 }
 0x4d6   :  { %v758_v39 = vsel %vm253_vm2, %v754_v37, -inf  ;;  %v753_v40 = vadd.f32 %v751_v36, %v5231_v59 }
 0x4d7   :  { %759 = vmax.xlane.f32.xlu1 %v758_v39 }
 0x4d8   :  { %v755_v42 = vsel %vm253_vm2, %v753_v40, -inf }
 0x4d9   :  { %756 = vmax.xlane.f32.xlu0 %v755_v42 }
 0x4e8   :  { %853 = vrot.lane.b32.xlu1 %v5209_v44, %s5054_s19 }
 0x4ec   :  { %1093 = vrot.lane.b32.xlu1 %v5211_v46, %s5055_s1 }
 0x4f0   :  { %1171 = vrot.lane.b32.xlu1 %v5209_v44, %s5055_s1 }
 0x4f4   :  { %1169 = vrot.lane.b32.xlu1 %v5209_v44, %s5056_s22 }
 0x560   :  { %v760_v43 = vpop.xlane.xlu1 %759 }
 0x561   :  { %v762_v45 = vsub.f32 %v754_v37, %v760_v43 }
 0x562   :  { %v757_v47 = vpop.xlane.xlu0 %756 }
 0x563   :  { %v765_v48 = vmul.f32 1.442695, %v762_v45  ;;  %v761_v49 = vsub.f32 %v753_v40, %v757_v47 }
 0x564   :  { %v854_v50 = vpop.permute.xlu1 %853 }
 0x565   :  { %4883 = vpow2.f32 %v765_v48  ;;  %v763_v51 = vmul.f32 1.442695, %v761_v49  ;;  %4615 = vmatpush3.msra.mxu1 %v854_v50 }
 0x566   :  { %4624 = vmatprep.subr.mxu1 %v246_v57 }
 0x567   :  { %4885 = vpow2.f32 %v763_v51 }
 0x568   :  { %v1094_v62 = vpop.permute.xlu1 %1093 }
 0x56c   :  { %v1172_v2 = vpop.permute.xlu1 %1171 }
 0x570   :  { %v1170_v6 = vpop.permute.xlu1 %1169 }
 0x572   :  { %v4884_v52 = vpop.eup %4883 }
 0x573   :  { %v770_v53 = vsel %vm253_vm2, %v4884_v52, 0.0 }
 0x574   :  { %v4886_v54 = vpop.eup %4885  ;;  %771 = vadd.xlane.f32.xlu0 %v770_v53 }
 0x575   :  { %v767_v55 = vsel %vm253_vm2, %v4886_v54, 0.0 }
 0x578   :  { %768 = vadd.xlane.f32.xlu0 %v767_v55 }
 0x58e   :  { %777 = vrot.lane.b32.xlu0 %v5211_v46, %s5054_s19 }
 0x592   :  { %1091 = vrot.lane.b32.xlu0 %v5211_v46, %s5056_s22 }
 0x5fd   :  { %v772_v58 = vpop.xlane.xlu0 %771 }
 0x5fe   :  { %4887 = vrcp.f32 %v772_v58 }
 0x601   :  { %v769_v60 = vpop.xlane.xlu0 %768 }
 0x602   :  { %4889 = vrcp.f32 %v769_v60 }
 0x605   :  { %v778_v61 = vpop.permute.xlu0 %777 }
 0x606   :  { %4610 = vmatpush3.msra.mxu0 %v778_v61 }
 0x607   :  { %4619 = vmatprep.subr.mxu0 %v247_v7 }
 0x609   :  { %v1092_v15 = vpop.permute.xlu0 %1091 }
 0x60b   :  { %v4888_v63 = vpop.eup %4887 }
 0x60c   :  { %v776_v0 = vmul.f32 %v4888_v63, %v4884_v52  ;;  %v248_v52 = vld [vmem:[%s5777_s7 + $0x10] sm:$0xff] }
 0x60e   :  { %4617 = vmatmul.mubr.msk.f32.vlgmr.msra.gmra.mxu1 %vm253_vm2, %v776_v0 }
 0x60f   :  { %v4890_v1 = vpop.eup %4889  ;;  %4626 = vmatprep.mubr.msk.f32.mxu1 %vm253_vm2, %v515_v29  ;;  %4625 = vmatpush3.msra.mxu1 %v246_v57 }
 0x610   :  { %4634 = vmatprep.subr.mxu1 %v5048_v41  ;;  %v775_v5 = vmul.f32 %v4890_v1, %v4886_v54 }
 0x612   :  { %4612 = vmatmul.mubr.msk.f32.vlgmr.msra.gmra.mxu0 %vm253_vm2, %v775_v5  ;;  %4627 = vmatmul.mubr.msk.f32.vlgmr.msra.gmra.mxu1 %vm253_vm2, %v591_v28 }
 0x613   :  { %4635 = vmatpush3.xpose.msk.msra.mxu1 %vm253_vm2, %v1172_v2  ;;  %4636 = vmatprep.mubr.msk.f32.mxu1 %vm5049_vm1, %v5048_v41 }
 0x614   :  { %4644 = vmatprep.subr.mxu1 %v5048_v41  ;;  %4620 = vmatpush3.msra.mxu0 %v247_v7 }
 0x615   :  { %4629 = vmatprep.subr.mxu0 %v5048_v41 }
 0x616   :  { %4637 = vmatmul.mubr.msk.f32.vlgmr.msra.gmra.mxu1 %vm253_vm2, %v1170_v6 }
 0x617   :  { %4646 = vmatprep.mubr.msk.f32.mxu1 %vm5049_vm1, %v5048_v41 }
 0x6ce   :  { %v925_v8 = vpop.f32.mrf.mxu1 }
 0x6d0   :  { %v4618_v9 = vpop.f32.mrf.mxu1 }
 0x6d2   :  { %v849_v10 = vpop.f32.mrf.mxu0  ;;  %v5306_v11 = vpop.f32.mrf.mxu1 }
 0x6d3   :  { %4621 = vmatprep.mubr.msk.f32.mxu0 %vm253_vm2, %v849_v10 }
 0x6d4   :  { %v4613_v12 = vpop.f32.mrf.mxu0  ;;  %4622 = vmatmul.mubr.msk.f32.vlgmr.msra.gmra.mxu0 %vm253_vm2, %v925_v8  ;;  %v5310_v13 = vpop.f32.mrf.mxu1 }
 0x6d5   :  { %4630 = vmatpush3.xpose.msk.msra.mxu0 %vm253_vm2, %v1094_v62  ;;  %4631 = vmatprep.mubr.msk.f32.mxu0 %vm5049_vm1, %v5048_v41 }
 0x6d6   :  { %v1243_v14 = vpop.f32.mrf.mxu1  ;;  %4639 = vmatprep.subr.mxu0 %v5048_v41 }
 0x6d7   :  { %v1248_v16 = vmul.f32 0.35355338, %v1243_v14 }
 0x6d8   :  { %4632 = vmatmul.mubr.msk.f32.vlgmr.msra.gmra.mxu0 %vm253_vm2, %v1092_v15  ;;  %v4638_v17 = vpop.f32.mrf.mxu1 }
 0x6d9   :  { %v1250_v18 = vadd.f32 %v1248_v16, %v5229_v56  ;;  %4641 = vmatprep.mubr.msk.f32.mxu0 %vm5049_vm1, %v5048_v41 }
 0x6db   :  { %v1254_v19 = vsel %vm253_vm2, %v1250_v18, -inf }
 0x6dc   :  { %1255 = vmax.xlane.f32.xlu1 %v1254_v19 }
 0x6ed   :  { %1349 = vrot.lane.b32.xlu1 %v5209_v44, %s5057_s27 }
 0x6f1   :  { %1510 = vrot.lane.b32.xlu1 %v5211_v46, %s5794_s28 }
 0x6f5   :  { %1588 = vrot.lane.b32.xlu1 %v5209_v44, %s5794_s28 }
 0x6f9   :  { %1586 = vrot.lane.b32.xlu1 %v5209_v44, %s5792_s29 }
 0x765   :  { %v1256_v20 = vpop.xlane.xlu1 %1255 }
 0x766   :  { %v1258_v22 = vsub.f32 %v1250_v18, %v1256_v20 }
 0x768   :  { %v1261_v23 = vmul.f32 1.442695, %v1258_v22 }
 0x769   :  { %v1350_v21 = vpop.permute.xlu1 %1349 }
 0x76a   :  { %4645 = vmatpush3.msra.mxu1 %v1350_v21  ;;  %4891 = vpow2.f32 %v1261_v23 }
 0x76b   :  { %4654 = vmatprep.subr.mxu1 %v5048_v41 }
 0x76d   :  { %v1511_v42 = vpop.permute.xlu1 %1510 }
 0x771   :  { %v1589_v60 = vpop.permute.xlu1 %1588 }
 0x775   :  { %v1587_v63 = vpop.permute.xlu1 %1586 }
 0x777   :  { %v4892_v31 = vpop.eup %4891 }
 0x778   :  { %v1266_v32 = vsel %vm253_vm2, %v4892_v31, 0.0 }
 0x794   :  { %v5330_v24 = vpop.f32.mrf.mxu0 }
 0x795   :  { %v1088_v7 = vadd.f32 %v5306_v11, %v5330_v24 }
 0x796   :  { %v5332_v25 = vpop.f32.mrf.mxu0 }
 0x797   :  { %v1083_v9 = vadd.f32 %v5310_v13, %v5332_v25 }
 0x798   :  { %v1165_v26 = vpop.f32.mrf.mxu0 }
 0x799   :  { %v1247_v27 = vmul.f32 0.35355338, %v1165_v26 }
 0x79a   :  { %v4633_v28 = vpop.f32.mrf.mxu0 }
 0x79b   :  { %v1249_v29 = vadd.f32 %v1247_v27, %v5231_v59 }
 0x79d   :  { %v1251_v30 = vsel %vm253_vm2, %v1249_v29, -inf }
 0x79e   :  { %1252 = vmax.xlane.f32.xlu0 %v1251_v30  ;;  %v249_v30 = vld [vmem:[%s5777_s7 + $0x18] sm:$0xff] }
 0x7a2   :  { %1267 = vadd.xlane.f32.xlu0 %v1266_v32 }
 0x827   :  { %v1253_v33 = vpop.xlane.xlu0 %1252 }
 0x828   :  { %v1257_v34 = vsub.f32 %v1249_v29, %v1253_v33 }
 0x82a   :  { %v1259_v35 = vmul.f32 1.442695, %v1257_v34 }
 0x82b   :  { %v1268_v36 = vpop.xlane.xlu0 %1267 }
 0x82c   :  { %4893 = vpow2.f32 %v1259_v35 }
 0x82d   :  { %4895 = vrcp.f32 %v1268_v36  ;;  %v4351_v36 = vld [vmem:[%s5778_s8] ss:$0 sm:$0xff] }
 0x839   :  { %v4894_v37 = vpop.eup %4893 }
 0x83a   :  { %v4896_v38 = vpop.eup %4895  ;;  %v1263_v39 = vsel %vm253_vm2, %v4894_v37, 0.0 }
 0x83b   :  { %1264 = vadd.xlane.f32.xlu0 %v1263_v39  ;;  %v1272_v40 = vmul.f32 %v4896_v38, %v4892_v31 }
 0x83d   :  { %4647 = vmatmul.mubr.msk.f32.vlgmr.msra.gmra.mxu1 %vm253_vm2, %v1272_v40 }
 0x83e   :  { %4655 = vmatpush3.xpose.msk.msra.mxu1 %vm253_vm2, %v1511_v42  ;;  %4656 = vmatprep.mubr.msk.f32.mxu1 %vm5049_vm1, %v5048_v41 }
 0x83f   :  { %4664 = vmatprep.subr.mxu1 %v5048_v41 }
 0x851   :  { %1273 = vrot.lane.b32.xlu0 %v5211_v46, %s5057_s27 }
 0x855   :  { %1508 = vrot.lane.b32.xlu0 %v5211_v46, %s5792_s29 }
 0x8c4   :  { %v1265_v43 = vpop.xlane.xlu0 %1264 }
 0x8c5   :  { %4897 = vrcp.f32 %v1265_v43 }
 0x8c8   :  { %v1274_v45 = vpop.permute.xlu0 %1273 }
 0x8c9   :  { %4640 = vmatpush3.msra.mxu0 %v1274_v45 }
 0x8ca   :  { %4649 = vmatprep.subr.mxu0 %v248_v52 }
 0x8cc   :  { %v1509_v47 = vpop.permute.xlu0 %1508 }
 0x8cd   :  { %4657 = vmatmul.mubr.msk.f32.vlgmr.msra.gmra.mxu1 %vm253_vm2, %v1509_v47 }
 0x8ce   :  { %4666 = vmatprep.mubr.msk.f32.mxu1 %vm5049_vm1, %v5048_v41 }
 0x8d2   :  { %v4898_v48 = vpop.eup %4897 }
 0x8d3   :  { %v1271_v49 = vmul.f32 %v4898_v48, %v4894_v37 }
 0x8d5   :  { %4642 = vmatmul.mubr.msk.f32.vlgmr.msra.gmra.mxu0 %vm253_vm2, %v1271_v49 }
 0x8d6   :  { %4650 = vmatpush3.msra.mxu0 %v248_v52  ;;  %v1985_v52 = vld [vmem:[%s5781_s11 + $0x8] sm:$0xff] }
 0x8d7   :  { %4659 = vmatprep.subr.mxu0 %v5048_v41 }
 0x8fd   :  { %v1421_v50 = vpop.f32.mrf.mxu1 }
 0x8ff   :  { %v4648_v51 = vpop.f32.mrf.mxu1 }
 0x900   :  { %v1986_v51 = vld [vmem:[%s5781_s11 + $0x10] sm:$0xff] }
 0x98d   :  { %v1582_v53 = vpop.f32.mrf.mxu1 }
 0x98e   :  { %v1664_v54 = vmul.f32 0.35355338, %v1582_v53  ;;  %v1984_v53 = vld [vmem:[%s5781_s11] sm:$0xff] }
 0x98f   :  { %v4658_v55 = vpop.f32.mrf.mxu1 }
 0x990   :  { %v1666_v57 = vadd.f32 %v1664_v54, %v5231_v59  ;;  %v2085_v54 = vld [vmem:[%s5783_s13 + $0x38] sm:$0xff]  ;;  %v2084_v55 = vld [vmem:[%s5783_s13 + $0x30] sm:$0xff] }
 0x992   :  { %v1668_v58 = vsel %vm253_vm2, %v1666_v57, -inf }
 0x993   :  { %1669 = vmax.xlane.f32.xlu0 %v1668_v58  ;;  %v2082_v58 = vld [vmem:[%s5783_s13 + $0x20] sm:$0xff] }
 0x995   :  { %v1345_v61 = vpop.f32.mrf.mxu0 }
 0x996   :  { %4651 = vmatprep.mubr.msk.f32.mxu0 %vm253_vm2, %v1345_v61 }
 0x997   :  { %v4643_v62 = vpop.f32.mrf.mxu0  ;;  %4652 = vmatmul.mubr.msk.f32.vlgmr.msra.gmra.mxu0 %vm253_vm2, %v1421_v50  ;;  %v1987_v50 = vld [vmem:[%s5781_s11 + $0x18] sm:$0xff] }
 0x998   :  { %4660 = vmatpush3.xpose.msk.msra.mxu0 %vm253_vm2, %v1589_v60  ;;  %4661 = vmatprep.mubr.msk.f32.mxu0 %vm5049_vm1, %v5048_v41 }
 0x999   :  { %4669 = vmatprep.subr.mxu0 %v5048_v41 }
 0x99b   :  { %4662 = vmatmul.mubr.msk.f32.vlgmr.msra.gmra.mxu0 %vm253_vm2, %v1587_v63 }
 0x99c   :  { %4671 = vmatprep.mubr.msk.f32.mxu0 %vm5049_vm1, %v5048_v41 }
 0xa1c   :  { %v1670_v0 = vpop.xlane.xlu0 %1669 }
 0xa1d   :  { %v1674_v1 = vsub.f32 %v1666_v57, %v1670_v0  ;;  %v2083_v57 = vld [vmem:[%s5783_s13 + $0x28] sm:$0xff] }
 0xa1f   :  { %v1676_v2 = vmul.f32 1.442695, %v1674_v1 }
 0xa21   :  { %4899 = vpow2.f32 %v1676_v2 }
 0xa2e   :  { %v4900_v5 = vpop.eup %4899 }
 0xa2f   :  { %v1680_v6 = vsel %vm253_vm2, %v4900_v5, 0.0 }
 0xa30   :  { %1681 = vadd.xlane.f32.xlu0 %v1680_v6 }
 0xa57   :  { %v4653_v8 = vpop.f32.mrf.mxu0 }
 0xa58   :  { %v1507_v10 = vadd.f32 %v4653_v8, %v1088_v7 }
 0xa59   :  { %v1497_v12 = vpop.f32.mrf.mxu0 }
 0xa5a   :  { %v1506_v14 = vadd.f32 %v1497_v12, %v1083_v9 }
 0xa5b   :  { %v1660_v15 = vpop.f32.mrf.mxu0 }
 0xa5c   :  { %v1665_v16 = vmul.f32 0.35355338, %v1660_v15 }
 0xa5d   :  { %v4663_v17 = vpop.f32.mrf.mxu0 }
 0xa5e   :  { %v1667_v18 = vadd.f32 %v1665_v16, %v5229_v56  ;;  %v4352_v16 = vld [vmem:[%s5779_s9] ss:$0 sm:$0xff] }
 0xa60   :  { %v1671_v19 = vsel %vm253_vm2, %v1667_v18, -inf }
 0xa61   :  { %1672 = vmax.xlane.f32.xlu1 %v1671_v19 }
 0xa72   :  { %1766 = vrot.lane.b32.xlu1 %v5209_v44, %s5790_s25 }
 0xab9   :  { %v1682_v24 = vpop.xlane.xlu0 %1681 }
 0xaea   :  { %v1673_v11 = vpop.xlane.xlu1 %1672 }
 0xaeb   :  { %v1675_v20 = vsub.f32 %v1667_v18, %v1673_v11  ;;  %v4353_v11 = vld [vmem:[%s5780_s10] ss:$0 sm:$0xff] }
 0xaed   :  { %v1678_v21 = vmul.f32 1.442695, %v1675_v20 }
 0xaee   :  { %v1767_v22 = vpop.permute.xlu1 %1766 }
 0xaef   :  { %4901 = vpow2.f32 %v1678_v21  ;;  %4670 = vmatpush3.msra.mxu0 %v1767_v22 }
 0xaf0   :  { %4903 = vrcp.f32 %v1682_v24  ;;  %4679 = vmatprep.subr.mxu0 %v1987_v50  ;;  %v2081_v24 = vld [vmem:[%s5783_s13 + $0x18] sm:$0xff] }
 0xafc   :  { %v4902_v13 = vpop.eup %4901 }
 0xafd   :  { %v1683_v23 = vsel %vm253_vm2, %v4902_v13, 0.0  ;;  %v4904_v26 = vpop.eup %4903 }
 0xafe   :  { %1684 = vadd.xlane.f32.xlu0 %v1683_v23  ;;  %v1688_v44 = vmul.f32 %v4904_v26, %v4900_v5  ;;  %v2079_v26 = vld [vmem:[%s5783_s13 + $0x8] sm:$0xff] }
 0xb14   :  { %1690 = vrot.lane.b32.xlu0 %v5211_v46, %s5790_s25 }
 0xb87   :  { %v1685_v25 = vpop.xlane.xlu0 %1684 }
 0xb88   :  { %4905 = vrcp.f32 %v1685_v25  ;;  %v2080_v25 = vld [vmem:[%s5783_s13 + $0x10] sm:$0xff] }
 0xb8b   :  { %v1691_v27 = vpop.permute.xlu0 %1690 }
 0xb8c   :  { %4665 = vmatpush3.msra.mxu1 %v1691_v27  ;;  %v2078_v27 = vld [vmem:[%s5783_s13] sm:$0xff] }
 0xb8d   :  { %4667 = vmatmul.mubr.msk.f32.vlgmr.msra.gmra.mxu1 %vm253_vm2, %v1688_v44  ;;  %4674 = vmatprep.subr.mxu1 %v249_v30  ;;  %v4354_v44 = vld [vmem:[%s5782_s12] ss:$0 sm:$0xff] }
 0xb8e   :  { %4675 = vmatpush3.msra.mxu1 %v249_v30 }
 0xb8f   :  { %4690 = vmatprep.subr.mxu1 %v2085_v54 }
 0xb95   :  { %v4906_v28 = vpop.eup %4905 }
 0xb96   :  { %v1689_v29 = vmul.f32 %v4906_v28, %v4902_v13 }
 0xb98   :  { %4672 = vmatmul.mubr.msk.f32.vlgmr.msra.gmra.mxu0 %vm253_vm2, %v1689_v29 }
 0xb99   :  { %4680 = vmatpush3.msra.mxu0 %v1987_v50  ;;  %v4364_v50 = vld [vmem:[%s5775_s5 + $0x20] sm:$0xff] }
 0xb9a   :  { %4681 = vmatprep.subr.mxu0 %v1986_v51 }
 0xb9b   :  { %4682 = vmatpush3.msra.mxu0 %v1986_v51 }
 0xb9c   :  { %4683 = vmatprep.subr.mxu0 %v1985_v52 }
 0xb9d   :  { %4684 = vmatpush3.msra.mxu0 %v1985_v52 }
 0xb9e   :  { %4685 = vmatprep.subr.mxu0 %v1984_v53 }
 0xb9f   :  { %4686 = vmatpush3.msra.mxu0 %v1984_v53 }
 0xc4d   :  { %v1762_v46 = vpop.f32.mrf.mxu1 }
 0xc4e   :  { %4676 = vmatprep.mubr.msk.f32.mxu1 %vm253_vm2, %v1762_v46 }
 0xc4f   :  { %v4668_v31 = vpop.f32.mrf.mxu1 }
 0xc58   :  { %v1838_v32 = vpop.f32.mrf.mxu0 }
 0xc59   :  { %4677 = vmatmul.mubr.msk.f32.vlgmr.msra.gmra.mxu1 %vm253_vm2, %v1838_v32 }
 0xc5a   :  { %v4673_v33 = vpop.f32.mrf.mxu0  ;;  %4691 = vmatpush3.msra.mxu1 %v2085_v54 }
 0xc5b   :  { %4692 = vmatprep.subr.mxu1 %v2084_v55  ;;  %v4357_v33 = vld [vmem:[%s5784_s14] ss:$0 sm:$0xff] }
 0xc5c   :  { %4693 = vmatpush3.msra.mxu1 %v2084_v55 }
 0xc5d   :  { %4694 = vmatprep.subr.mxu1 %v2083_v57 }
 0xc5e   :  { %4695 = vmatpush3.msra.mxu1 %v2083_v57 }
 0xc5f   :  { %4696 = vmatprep.subr.mxu1 %v2082_v58 }
 0xc60   :  { %4697 = vmatpush3.msra.mxu1 %v2082_v58 }
 0xc61   :  { %4698 = vmatprep.subr.mxu1 %v2081_v24 }
 0xc62   :  { %4699 = vmatpush3.msra.mxu1 %v2081_v24 }
 0xc63   :  { %4700 = vmatprep.subr.mxu1 %v2080_v25 }
 0xc64   :  { %4701 = vmatpush3.msra.mxu1 %v2080_v25 }
 0xc65   :  { %4702 = vmatprep.subr.mxu1 %v2079_v26 }
 0xc66   :  { %4703 = vmatpush3.msra.mxu1 %v2079_v26 }
 0xc67   :  { %4704 = vmatprep.subr.mxu1 %v2078_v27 }
 0xc68   :  { %4705 = vmatpush3.msra.mxu1 %v2078_v27 }
 0xc69   :  { %4725 = vmatprep.subr.mxu1 %v5048_v41 }
 0xd19   :  { %v4678_v34 = vpop.f32.mrf.mxu1 }
 0xd1a   :  { %v1924_v35 = vadd.f32 %v4678_v34, %v1507_v10 }
 0xd1b   :  { %v1914_v37 = vpop.f32.mrf.mxu1 }
 0xd1c   :  { %v1926_v38 = vadd.f32 %v1924_v35, %v5166_v4  ;;  %v1923_v39 = vadd.f32 %v1914_v37, %v1506_v14 }
 0xd1e   :  { %v5389_v40 = vadd.f32 %v4351_v36, %v1926_v38  ;;  %v1925_v42 = vadd.f32 %v1923_v39, %v5164_v3 }
 0xd20   :  { %v5392_v43 = vadd.f32 %v4351_v36, %v1925_v42  ;;  %v1941_v45 = vsel %vm107_vm0, %v5389_v40, 0.0  ;;  %v1945_v4 = vmul.f32 %v5389_v40, %v5389_v40 }
 0xd21   :  { %1942 = vadd.xlane.f32.xlu0 %v1941_v45 }
 0xd22   :  { %v1938_v47 = vsel %vm107_vm0, %v5392_v43, 0.0  ;;  %v1944_v48 = vmul.f32 %v5392_v43, %v5392_v43  ;;  %v1949_v3 = vsel %vm107_vm0, %v1945_v4, 0.0  ;;  %v4367_v4 = vld [vmem:[%s5775_s5 + $0x38] sm:$0xff] }
 0xd23   :  { %1939 = vadd.xlane.f32.xlu1 %v1938_v47  ;;  %4709 = vmatprep.subr.mxu0 %v4367_v4 }
 0xd24   :  { %v1946_v49 = vsel %vm107_vm0, %v1944_v48, 0.0 }
 0xd25   :  { %1947 = vadd.xlane.f32.xlu0 %v1946_v49  ;;  %v4366_v49 = vld [vmem:[%s5775_s5 + $0x30] sm:$0xff] }
 0xd27   :  { %1950 = vadd.xlane.f32.xlu1 %v1949_v3  ;;  %v4365_v3 = vld [vmem:[%s5775_s5 + $0x28] sm:$0xff] }
 0xdaa   :  { %v1943_v60 = vpop.xlane.xlu0 %1942 }
 0xdab   :  { %v1953_v62 = vmul.f32 0.03125, %v1943_v60 }
 0xdac   :  { %v1940_v61 = vpop.xlane.xlu1 %1939 }
 0xdad   :  { %v1952_v63 = vmul.f32 0.03125, %v1940_v61  ;;  %v1957_v6 = vmul.f32 %v1953_v62, %v1953_v62  ;;  %v1961_v17 = vsub.f32 %v5389_v40, %v1953_v62 }
 0xdae   :  { %v1948_v0 = vpop.xlane.xlu0 %1947 }
 0xdaf   :  { %v1956_v1 = vmul.f32 %v1952_v63, %v1952_v63  ;;  %v1954_v2 = vmul.f32 0.03125, %v1948_v0  ;;  %v1960_v14 = vsub.f32 %v5392_v43, %v1952_v63 }
 0xdb0   :  { %v1951_v5 = vpop.xlane.xlu1 %1950 }
 0xdb1   :  { %v1958_v7 = vsub.f32 %v1954_v2, %v1956_v1  ;;  %v1955_v8 = vmul.f32 0.03125, %v1951_v5 }
 0xdb3   :  { %v1962_v9 = vadd.f32 1e-05, %v1958_v7  ;;  %v1959_v10 = vsub.f32 %v1955_v8, %v1957_v6  ;;  %v4362_v8 = vld [vmem:[%s5773_s3 + $0x1] ss:$0 sm:$0xff]  ;;  %s5061_s3 = smov [#allocation8]  }
 0xdb5   :  { %4907 = vrsqrt.f32 %v1962_v9  ;;  %v1963_v12 = vadd.f32 1e-05, %v1959_v10 }
 0xdb7   :  { %4909 = vrsqrt.f32 %v1963_v12 }
 0xdc2   :  { %v4908_v15 = vpop.eup %4907 }
 0xdc3   :  { %v1966_v18 = vmul.f32 %v4908_v15, %v1960_v14  ;;  %v4363_v15 = vld [vmem:[%s5774_s4 + $0x1] ss:$0 sm:$0xff]  ;;  %s4301_s4 = sshll.u32 %s5061_s3, 4  ;;  %s4302_s4 = int_to_ptr.vmem [resolvable:$true] %s4301_s4 }
 0xdc4   :  { %v4910_v19 = vpop.eup %4909  ;;  %p5020_p2 = scmp.lt.s32.totalorder %s4302_s4, %s4302_s4 }
 0xdc5   :  { %v1967_v20 = vmul.f32 %v4910_v19, %v1961_v17  ;;  %v1974_v21 = vmul.f32 %v4352_v16, %v1966_v18  ;;  %v4369_v19 = vld [vmem:[%s5776_s6 + $0x1] ss:$0 sm:$0xff] }
 0xdc7   :  { %v1975_v22 = vmul.f32 %v4352_v16, %v1967_v20  ;;  %v1982_v13 = vadd.f32 %v4353_v11, %v1974_v21 }
 0xdc9   :  { %v1983_v23 = vadd.f32 %v4353_v11, %v1975_v22  ;;  %4687 = vmatprep.mubr.msk.f32.mxu0 %vm107_vm0, %v1982_v13 }
 0xdcb   :  { %4688 = vmatmul.mubr.msk.f32.vlgmr.msra.gmra.mxu0 %vm107_vm0, %v1983_v23 }
 0xdcc   :  { %4710 = vmatpush3.msra.mxu0 %v4367_v4 }
 0xdcd   :  { %4711 = vmatprep.subr.mxu0 %v4366_v49 }
 0xdce   :  { %4712 = vmatpush3.msra.mxu0 %v4366_v49 }
 0xdcf   :  { %4713 = vmatprep.subr.mxu0 %v4365_v3 }
 0xdd0   :  { %4714 = vmatpush3.msra.mxu0 %v4365_v3 }
 0xdd1   :  { %4715 = vmatprep.subr.mxu0 %v4364_v50 }
 0xdd2   :  { %4716 = vmatpush3.msra.mxu0 %v4364_v50 }
 0xdd3   :  { %4720 = vmatprep.subr.mxu0 %v5048_v41 }
 0xe8b   :  { %v4689_v28 = vpop.f32.mrf.mxu0 }
 0xe8c   :  { %v2073_v29 = vadd.f32 %v4689_v28, %v4354_v44 }
 0xe8d   :  { %v2067_v30 = vpop.f32.mrf.mxu0 }
 0xe8e   :  { %v2068_v46 = vadd.f32 %v4354_v44, %v2067_v30  ;;  %v2077_v32 = vmax.f32 %v2073_v29, 0.0 }
 0xe90   :  { %v2076_v31 = vmax.f32 %v2068_v46, 0.0 }
 0xe92   :  { %4706 = vmatprep.mubr.msk.f32.mxu1 %vm2093_vm3, %v2076_v31 }
 0xe93   :  { %4707 = vmatmul.mubr.msk.f32.vlgmr.msra.gmra.mxu1 %vm2093_vm3, %v2077_v32 }
 0xe94   :  { %4727 = vmatprep.mubr.msk.f32.mxu1 %vm5049_vm1, %v5048_v41 }
 0xf53   :  { %v4708_v34 = vpop.f32.mrf.mxu1 }
 0xf54   :  { %v2172_v35 = vadd.f32 %v4708_v34, %v4357_v33 }
 0xf55   :  { %v2166_v36 = vpop.f32.mrf.mxu1 }
 0xf56   :  { %v5462_v37 = vadd.f32 %v2172_v35, %v5389_v40  ;;  %v2167_v38 = vadd.f32 %v4357_v33, %v2166_v36 }
 0xf58   :  { %v5465_v39 = vadd.f32 %v2167_v38, %v5392_v43  ;;  %v2184_v42 = vsel %vm107_vm0, %v5462_v37, 0.0  ;;  %v2188_v45 = vmul.f32 %v5462_v37, %v5462_v37 }
 0xf59   :  { %2185 = vadd.xlane.f32.xlu1 %v2184_v42 }
 0xf5a   :  { %v2181_v47 = vsel %vm107_vm0, %v5465_v39, 0.0  ;;  %v2187_v48 = vmul.f32 %v5465_v39, %v5465_v39  ;;  %v2192_v40 = vsel %vm107_vm0, %v2188_v45, 0.0 }
 0xf5b   :  { %2182 = vadd.xlane.f32.xlu0 %v2181_v47 }
 0xf5c   :  { %v2189_v43 = vsel %vm107_vm0, %v2187_v48, 0.0 }
 0xf5d   :  { %2193 = vadd.xlane.f32.xlu1 %v2192_v40 }
 0xf5f   :  { %2190 = vadd.xlane.f32.xlu0 %v2189_v43 }
 0xfe2   :  { %v2186_v51 = vpop.xlane.xlu1 %2185 }
 0xfe3   :  { %v2196_v52 = vmul.f32 0.03125, %v2186_v51 }
 0xfe4   :  { %v2183_v53 = vpop.xlane.xlu0 %2182 }
 0xfe5   :  { %v2195_v54 = vmul.f32 0.03125, %v2183_v53  ;;  %v2200_v57 = vmul.f32 %v2196_v52, %v2196_v52  ;;  %v2204_v5 = vsub.f32 %v5462_v37, %v2196_v52 }
 0xfe6   :  { %v2194_v55 = vpop.xlane.xlu1 %2193 }
 0xfe7   :  { %v2198_v58 = vmul.f32 0.03125, %v2194_v55  ;;  %v2199_v61 = vmul.f32 %v2195_v54, %v2195_v54  ;;  %v2203_v7 = vsub.f32 %v5465_v39, %v2195_v54 }
 0xfe8   :  { %v2191_v60 = vpop.xlane.xlu0 %2190 }
 0xfe9   :  { %v2202_v62 = vsub.f32 %v2198_v58, %v2200_v57  ;;  %v2197_v63 = vmul.f32 0.03125, %v2191_v60 }
 0xfeb   :  { %v2206_v0 = vadd.f32 1e-05, %v2202_v62  ;;  %v2201_v1 = vsub.f32 %v2197_v63, %v2199_v61 }
 0xfed   :  { %4911 = vrsqrt.f32 %v2206_v0  ;;  %v2205_v2 = vadd.f32 1e-05, %v2201_v1 }
 0xfef   :  { %4913 = vrsqrt.f32 %v2205_v2 }
 0xffa   :  { %v4912_v6 = vpop.eup %4911 }
 0xffb   :  { %v2210_v9 = vmul.f32 %v4912_v6, %v2204_v5 }
 0xffc   :  { %v4914_v10 = vpop.eup %4913 }
 0xffd   :  { %v2209_v12 = vmul.f32 %v4914_v10, %v2203_v7  ;;  %v2218_v14 = vmul.f32 %v4362_v8, %v2210_v9 }
 0xfff   :  { %v2217_v16 = vmul.f32 %v4362_v8, %v2209_v12  ;;  %v2226_v18 = vadd.f32 %v4363_v15, %v2218_v14 }
0x1001   :  { %v2225_v17 = vadd.f32 %v4363_v15, %v2217_v16 }
0x1003   :  { %4717 = vmatprep.mubr.msk.f32.mxu0 %vm107_vm0, %v2225_v17 }
0x1004   :  { %4718 = vmatmul.mubr.msk.f32.vlgmr.msra.gmra.mxu0 %vm107_vm0, %v2226_v18 }
0x1005   :  { %4722 = vmatprep.mubr.msk.f32.mxu0 %vm5049_vm1, %v5048_v41 }
0x10c4   :  { %v4719_v11 = vpop.f32.mrf.mxu0 }
0x10c5   :  { %v5505_v20 = vadd.f32 %v4719_v11, %v4369_v19 }
0x10c6   :  { %v2312_v21 = vpop.f32.mrf.mxu0 }
0x10c7   :  { %v5507_v22 = vadd.f32 %v4369_v19, %v2312_v21  ;;  %2404 = vrot.lane.b32.xlu1 %v5505_v20, %s5050_s2 }
0x10c9   :  { %2327 = vrot.lane.b32.xlu0 %v5507_v22, %s5050_s2 }
0x1139   :  { %v2405_v13 = vpop.permute.xlu1 %2404 }
0x113a   :  { %4726 = vmatpush3.xpose.msk.msra.mxu1 %vm253_vm2, %v2405_v13 }
0x113b   :  { %v2328_v23 = vpop.permute.xlu0 %2327  ;;  %4735 = vmatprep.subr.mxu1 %v5048_v41 }
0x113c   :  { %4721 = vmatpush3.xpose.msk.msra.mxu0 %vm253_vm2, %v2328_v23 }
0x113d   :  { %4728 = vmatmul.mubr.msk.f32.vlgmr.msra.gmra.mxu1 %vm253_vm2, %v5505_v20  ;;  %4730 = vmatprep.subr.mxu0 %v5048_v41 }
0x113e   :  { %4737 = vmatprep.mubr.msk.f32.mxu1 %vm5049_vm1, %v5048_v41 }
0x113f   :  { %4723 = vmatmul.mubr.msk.f32.vlgmr.msra.gmra.mxu0 %vm253_vm2, %v5507_v22 }
0x1140   :  { %4732 = vmatprep.mubr.msk.f32.mxu0 %vm5049_vm1, %v5048_v41 }
0x11fd   :  { %v2476_v24 = vpop.f32.mrf.mxu1 }
0x11fe   :  { %v2481_v25 = vmul.f32 0.35355338, %v2476_v24  ;;  %v4372_v24 = vld [vmem:[%s5777_s7 + $0x20] sm:$0xff] }
0x11ff   :  { %v2399_v26 = vpop.f32.mrf.mxu0  ;;  %v4729_v27 = vpop.f32.mrf.mxu1 }
0x1200   :  { %v2480_v44 = vmul.f32 0.35355338, %v2399_v26  ;;  %v2483_v28 = vadd.f32 %v2481_v25, %v5229_v56 }
0x1201   :  { %v4724_v29 = vpop.f32.mrf.mxu0 }
0x1202   :  { %v2487_v30 = vsel %vm253_vm2, %v2483_v28, -inf  ;;  %v2482_v46 = vadd.f32 %v2480_v44, %v5231_v59 }
0x1203   :  { %2488 = vmax.xlane.f32.xlu0 %v2487_v30 }
0x1204   :  { %v2484_v31 = vsel %vm253_vm2, %v2482_v46, -inf }
0x1205   :  { %2485 = vmax.xlane.f32.xlu1 %v2484_v31 }
0x128c   :  { %v2489_v32 = vpop.xlane.xlu0 %2488 }
0x128d   :  { %v2491_v33 = vsub.f32 %v2483_v28, %v2489_v32 }
0x128e   :  { %v2486_v34 = vpop.xlane.xlu1 %2485 }
0x128f   :  { %v2494_v35 = vmul.f32 1.442695, %v2491_v33  ;;  %v2490_v36 = vsub.f32 %v2482_v46, %v2486_v34  ;;  %v4373_v33 = vld [vmem:[%s5777_s7 + $0x28] sm:$0xff] }
0x1291   :  { %4915 = vpow2.f32 %v2494_v35  ;;  %v2492_v38 = vmul.f32 1.442695, %v2490_v36 }
0x1293   :  { %4917 = vpow2.f32 %v2492_v38 }
0x129e   :  { %v4916_v42 = vpop.eup %4915 }
0x129f   :  { %v2499_v45 = vsel %vm253_vm2, %v4916_v42, 0.0 }
0x12a0   :  { %v4918_v47 = vpop.eup %4917  ;;  %2500 = vadd.xlane.f32.xlu1 %v2499_v45 }
0x12a1   :  { %v2496_v48 = vsel %vm253_vm2, %v4918_v47, 0.0 }
0x12a2   :  { %2497 = vadd.xlane.f32.xlu0 %v2496_v48 }
0x12b1   :  { %2582 = vrot.lane.b32.xlu1 %v5505_v20, %s5051_s0 }
0x12b5   :  { %2660 = vrot.lane.b32.xlu1 %v5507_v22, %s5052_s30 }
0x12b8   :  { %2506 = vrot.lane.b32.xlu0 %v5507_v22, %s5051_s0 }
0x12b9   :  { %2738 = vrot.lane.b32.xlu1 %v5505_v20, %s5052_s30  ;;  %s5800_s30 = smov 72  }
0x12bc   :  { %2658 = vrot.lane.b32.xlu0 %v5507_v22, %s5053_s18 }
0x12bd   :  { %2736 = vrot.lane.b32.xlu1 %v5505_v20, %s5053_s18  ;;  %s5801_s18 = smov 104  }
0x1329   :  { %v2501_v40 = vpop.xlane.xlu1 %2500 }
0x132a   :  { %4919 = vrcp.f32 %v2501_v40 }
0x132b   :  { %v2498_v43 = vpop.xlane.xlu0 %2497 }
0x132c   :  { %4921 = vrcp.f32 %v2498_v43 }
0x132d   :  { %v2583_v4 = vpop.permute.xlu1 %2582 }
0x132e   :  { %4736 = vmatpush3.msra.mxu1 %v2583_v4 }
0x132f   :  { %v2507_v49 = vpop.permute.xlu0 %2506  ;;  %4745 = vmatprep.subr.mxu1 %v5048_v41 }
0x1330   :  { %4731 = vmatpush3.msra.mxu0 %v2507_v49 }
0x1331   :  { %v2661_v3 = vpop.permute.xlu1 %2660  ;;  %4740 = vmatprep.subr.mxu0 %v5048_v41 }
0x1333   :  { %v2659_v57 = vpop.permute.xlu0 %2658 }
0x1335   :  { %v2739_v51 = vpop.permute.xlu1 %2738 }
0x1337   :  { %v4920_v50 = vpop.eup %4919 }
0x1338   :  { %v2505_v52 = vmul.f32 %v4920_v50, %v4916_v42 }
0x1339   :  { %v4922_v53 = vpop.eup %4921  ;;  %v2737_v55 = vpop.permute.xlu1 %2736 }
0x133a   :  { %4738 = vmatmul.mubr.msk.f32.vlgmr.msra.gmra.mxu1 %vm253_vm2, %v2505_v52  ;;  %v2504_v54 = vmul.f32 %v4922_v53, %v4918_v47 }
0x133b   :  { %4746 = vmatpush3.xpose.msk.msra.mxu1 %vm253_vm2, %v2739_v51  ;;  %4747 = vmatprep.mubr.msk.f32.mxu1 %vm5049_vm1, %v5048_v41 }
0x133c   :  { %4733 = vmatmul.mubr.msk.f32.vlgmr.msra.gmra.mxu0 %vm253_vm2, %v2504_v54  ;;  %4755 = vmatprep.subr.mxu1 %v5048_v41 }
0x133d   :  { %4741 = vmatpush3.xpose.msk.msra.mxu0 %vm253_vm2, %v2661_v3  ;;  %4742 = vmatprep.mubr.msk.f32.mxu0 %vm5049_vm1, %v5048_v41 }
0x133e   :  { %4748 = vmatmul.mubr.msk.f32.vlgmr.msra.gmra.mxu1 %vm253_vm2, %v2737_v55  ;;  %4750 = vmatprep.subr.mxu0 %v5048_v41 }
0x133f   :  { %4757 = vmatprep.mubr.msk.f32.mxu1 %vm5049_vm1, %v5048_v41 }
0x1340   :  { %4743 = vmatmul.mubr.msk.f32.vlgmr.msra.gmra.mxu0 %vm253_vm2, %v2659_v57 }
0x1341   :  { %4752 = vmatprep.mubr.msk.f32.mxu0 %vm5049_vm1, %v5048_v41 }
0x13fa   :  { %v2654_v58 = vpop.f32.mrf.mxu1 }
0x13fc   :  { %v2578_v60 = vpop.f32.mrf.mxu0  ;;  %v4739_v61 = vpop.f32.mrf.mxu1 }
0x13fe   :  { %v4734_v62 = vpop.f32.mrf.mxu0  ;;  %v2810_v63 = vpop.f32.mrf.mxu1 }
0x13ff   :  { %v2815_v0 = vmul.f32 0.35355338, %v2810_v63 }
0x1400   :  { %v2732_v1 = vpop.f32.mrf.mxu0  ;;  %v4749_v2 = vpop.f32.mrf.mxu1 }
0x1401   :  { %v2814_v5 = vmul.f32 0.35355338, %v2732_v1  ;;  %v2817_v6 = vadd.f32 %v2815_v0, %v5229_v56 }
0x1402   :  { %v4744_v7 = vpop.f32.mrf.mxu0 }
0x1403   :  { %v2821_v8 = vsel %vm253_vm2, %v2817_v6, -inf  ;;  %v2816_v9 = vadd.f32 %v2814_v5, %v5231_v59 }
0x1404   :  { %2822 = vmax.xlane.f32.xlu1 %v2821_v8 }
0x1405   :  { %v2818_v10 = vsel %vm253_vm2, %v2816_v9, -inf }
0x1406   :  { %2819 = vmax.xlane.f32.xlu0 %v2818_v10 }
0x1415   :  { %2916 = vrot.lane.b32.xlu1 %v5505_v20, %s5054_s19 }
0x1419   :  { %3156 = vrot.lane.b32.xlu1 %v5507_v22, %s5055_s1 }
0x141d   :  { %3234 = vrot.lane.b32.xlu1 %v5505_v20, %s5055_s1 }
0x1421   :  { %3232 = vrot.lane.b32.xlu1 %v5505_v20, %s5056_s22 }
0x148d   :  { %v2823_v12 = vpop.xlane.xlu1 %2822 }
0x148e   :  { %v2825_v14 = vsub.f32 %v2817_v6, %v2823_v12 }
0x148f   :  { %v2820_v15 = vpop.xlane.xlu0 %2819 }
0x1490   :  { %v2828_v16 = vmul.f32 1.442695, %v2825_v14  ;;  %v2824_v17 = vsub.f32 %v2816_v9, %v2820_v15 }
0x1491   :  { %v2917_v18 = vpop.permute.xlu1 %2916 }
0x1492   :  { %4923 = vpow2.f32 %v2828_v16  ;;  %v2826_v19 = vmul.f32 1.442695, %v2824_v17  ;;  %4756 = vmatpush3.msra.mxu1 %v2917_v18 }
0x1493   :  { %4765 = vmatprep.subr.mxu1 %v4372_v24 }
0x1494   :  { %4925 = vpow2.f32 %v2826_v19 }
0x1495   :  { %v3157_v44 = vpop.permute.xlu1 %3156 }
0x1499   :  { %v3235_v46 = vpop.permute.xlu1 %3234 }
0x149d   :  { %v3233_v32 = vpop.permute.xlu1 %3232 }
0x149f   :  { %v4924_v11 = vpop.eup %4923 }
0x14a0   :  { %v2833_v21 = vsel %vm253_vm2, %v4924_v11, 0.0 }
0x14a1   :  { %v4926_v13 = vpop.eup %4925  ;;  %2834 = vadd.xlane.f32.xlu0 %v2833_v21 }
0x14a2   :  { %v2830_v23 = vsel %vm253_vm2, %v4926_v13, 0.0 }
0x14a5   :  { %2831 = vadd.xlane.f32.xlu0 %v2830_v23 }
0x14bb   :  { %2840 = vrot.lane.b32.xlu0 %v5507_v22, %s5054_s19 }
0x14bf   :  { %3154 = vrot.lane.b32.xlu0 %v5507_v22, %s5056_s22  ;;  %s5802_s22 = smov 40  }
0x152a   :  { %v2835_v25 = vpop.xlane.xlu0 %2834 }
0x152b   :  { %4927 = vrcp.f32 %v2835_v25 }
0x152e   :  { %v2832_v26 = vpop.xlane.xlu0 %2831 }
0x152f   :  { %4929 = vrcp.f32 %v2832_v26 }
0x1532   :  { %v2841_v27 = vpop.permute.xlu0 %2840 }
0x1533   :  { %4751 = vmatpush3.msra.mxu0 %v2841_v27 }
0x1534   :  { %4760 = vmatprep.subr.mxu0 %v4373_v33 }
0x1536   :  { %v3155_v48 = vpop.permute.xlu0 %3154 }
0x1538   :  { %v4928_v28 = vpop.eup %4927 }
0x1539   :  { %v2839_v29 = vmul.f32 %v4928_v28, %v4924_v11  ;;  %v4374_v11 = vld [vmem:[%s5777_s7 + $0x30] sm:$0xff] }
0x153b   :  { %4758 = vmatmul.mubr.msk.f32.vlgmr.msra.gmra.mxu1 %vm253_vm2, %v2839_v29 }
0x153c   :  { %v4930_v30 = vpop.eup %4929  ;;  %4767 = vmatprep.mubr.msk.f32.mxu1 %vm253_vm2, %v2578_v60  ;;  %4766 = vmatpush3.msra.mxu1 %v4372_v24 }
0x153d   :  { %4775 = vmatprep.subr.mxu1 %v5048_v41  ;;  %v2838_v31 = vmul.f32 %v4930_v30, %v4926_v13 }
0x153f   :  { %4753 = vmatmul.mubr.msk.f32.vlgmr.msra.gmra.mxu0 %vm253_vm2, %v2838_v31  ;;  %4768 = vmatmul.mubr.msk.f32.vlgmr.msra.gmra.mxu1 %vm253_vm2, %v2654_v58 }
0x1540   :  { %4776 = vmatpush3.xpose.msk.msra.mxu1 %vm253_vm2, %v3235_v46  ;;  %4777 = vmatprep.mubr.msk.f32.mxu1 %vm5049_vm1, %v5048_v41 }
0x1541   :  { %4785 = vmatprep.subr.mxu1 %v5048_v41  ;;  %4761 = vmatpush3.msra.mxu0 %v4373_v33 }
0x1542   :  { %4770 = vmatprep.subr.mxu0 %v5048_v41 }
0x1543   :  { %4778 = vmatmul.mubr.msk.f32.vlgmr.msra.gmra.mxu1 %vm253_vm2, %v3233_v32 }
0x1544   :  { %4787 = vmatprep.mubr.msk.f32.mxu1 %vm5049_vm1, %v5048_v41 }
0x15fb   :  { %v2988_v34 = vpop.f32.mrf.mxu1 }
0x15fd   :  { %v4759_v35 = vpop.f32.mrf.mxu1 }
0x15ff   :  { %v2912_v36 = vpop.f32.mrf.mxu0  ;;  %v5598_v38 = vpop.f32.mrf.mxu1 }
0x1600   :  { %4762 = vmatprep.mubr.msk.f32.mxu0 %vm253_vm2, %v2912_v36 }
0x1601   :  { %v4754_v42 = vpop.f32.mrf.mxu0  ;;  %4763 = vmatmul.mubr.msk.f32.vlgmr.msra.gmra.mxu0 %vm253_vm2, %v2988_v34  ;;  %v5602_v45 = vpop.f32.mrf.mxu1 }
0x1602   :  { %4771 = vmatpush3.xpose.msk.msra.mxu0 %vm253_vm2, %v3157_v44  ;;  %4772 = vmatprep.mubr.msk.f32.mxu0 %vm5049_vm1, %v5048_v41 }
0x1603   :  { %v3306_v47 = vpop.f32.mrf.mxu1  ;;  %4780 = vmatprep.subr.mxu0 %v5048_v41 }
0x1604   :  { %v3311_v40 = vmul.f32 0.35355338, %v3306_v47 }
0x1605   :  { %4773 = vmatmul.mubr.msk.f32.vlgmr.msra.gmra.mxu0 %vm253_vm2, %v3155_v48  ;;  %v4779_v43 = vpop.f32.mrf.mxu1 }
0x1606   :  { %v3313_v4 = vadd.f32 %v3311_v40, %v5229_v56  ;;  %4782 = vmatprep.mubr.msk.f32.mxu0 %vm5049_vm1, %v5048_v41 }
0x1608   :  { %v3317_v49 = vsel %vm253_vm2, %v3313_v4, -inf }
0x1609   :  { %3318 = vmax.xlane.f32.xlu1 %v3317_v49 }
0x161a   :  { %3412 = vrot.lane.b32.xlu1 %v5505_v20, %s5057_s27 }
0x161e   :  { %3573 = vrot.lane.b32.xlu1 %v5507_v22, %s5800_s30 }
0x1622   :  { %3651 = vrot.lane.b32.xlu1 %v5505_v20, %s5800_s30 }
0x1626   :  { %3649 = vrot.lane.b32.xlu1 %v5505_v20, %s5801_s18 }
0x1692   :  { %v3319_v3 = vpop.xlane.xlu1 %3318 }
0x1693   :  { %v3321_v51 = vsub.f32 %v3313_v4, %v3319_v3 }
0x1695   :  { %v3324_v52 = vmul.f32 1.442695, %v3321_v51 }
0x1696   :  { %v3413_v50 = vpop.permute.xlu1 %3412 }
0x1697   :  { %4786 = vmatpush3.msra.mxu1 %v3413_v50  ;;  %4931 = vpow2.f32 %v3324_v52 }
0x1698   :  { %4795 = vmatprep.subr.mxu1 %v5048_v41 }
0x169a   :  { %v3574_v10 = vpop.permute.xlu1 %3573 }
0x169e   :  { %v3652_v26 = vpop.permute.xlu1 %3651 }
0x16a2   :  { %v3650_v28 = vpop.permute.xlu1 %3649 }
0x16a4   :  { %v4932_v62 = vpop.eup %4931 }
0x16a5   :  { %v3329_v63 = vsel %vm253_vm2, %v4932_v62, 0.0 }
0x16c1   :  { %v5622_v53 = vpop.f32.mrf.mxu0 }
0x16c2   :  { %v3151_v32 = vadd.f32 %v5598_v38, %v5622_v53 }
0x16c3   :  { %v5624_v54 = vpop.f32.mrf.mxu0 }
0x16c4   :  { %v3146_v34 = vadd.f32 %v5602_v45, %v5624_v54 }
0x16c5   :  { %v3228_v55 = vpop.f32.mrf.mxu0 }
0x16c6   :  { %v3310_v57 = vmul.f32 0.35355338, %v3228_v55 }
0x16c7   :  { %v4774_v58 = vpop.f32.mrf.mxu0 }
0x16c8   :  { %v3312_v60 = vadd.f32 %v3310_v57, %v5231_v59  ;;  %v4375_v57 = vld [vmem:[%s5777_s7 + $0x38] sm:$0xff] }
0x16ca   :  { %v3314_v61 = vsel %vm253_vm2, %v3312_v60, -inf }
0x16cb   :  { %3315 = vmax.xlane.f32.xlu0 %v3314_v61 }
0x16cf   :  { %3330 = vadd.xlane.f32.xlu0 %v3329_v63 }
0x1754   :  { %v3316_v0 = vpop.xlane.xlu0 %3315 }
0x1755   :  { %v3320_v1 = vsub.f32 %v3312_v60, %v3316_v0  ;;  %v4409_v0 = vld [vmem:[%s5778_s8 + $0x1] ss:$0 sm:$0xff] }
0x1757   :  { %v3322_v2 = vmul.f32 1.442695, %v3320_v1 }
0x1758   :  { %v3331_v5 = vpop.xlane.xlu0 %3330 }
0x1759   :  { %4933 = vpow2.f32 %v3322_v2 }
0x175a   :  { %4935 = vrcp.f32 %v3331_v5 }
0x1766   :  { %v4934_v6 = vpop.eup %4933 }
0x1767   :  { %v4936_v7 = vpop.eup %4935  ;;  %v3326_v8 = vsel %vm253_vm2, %v4934_v6, 0.0 }
0x1768   :  { %3327 = vadd.xlane.f32.xlu0 %v3326_v8  ;;  %v3335_v9 = vmul.f32 %v4936_v7, %v4932_v62 }
0x176a   :  { %4788 = vmatmul.mubr.msk.f32.vlgmr.msra.gmra.mxu1 %vm253_vm2, %v3335_v9 }
0x176b   :  { %4796 = vmatpush3.xpose.msk.msra.mxu1 %vm253_vm2, %v3574_v10  ;;  %4797 = vmatprep.mubr.msk.f32.mxu1 %vm5049_vm1, %v5048_v41 }
0x176c   :  { %4805 = vmatprep.subr.mxu1 %v5048_v41 }
0x177e   :  { %3336 = vrot.lane.b32.xlu0 %v5507_v22, %s5057_s27 }
0x1782   :  { %3571 = vrot.lane.b32.xlu0 %v5507_v22, %s5801_s18 }
0x17f1   :  { %v3328_v12 = vpop.xlane.xlu0 %3327 }
0x17f2   :  { %4937 = vrcp.f32 %v3328_v12 }
0x17f5   :  { %v3337_v14 = vpop.permute.xlu0 %3336 }
0x17f6   :  { %4781 = vmatpush3.msra.mxu0 %v3337_v14 }
0x17f7   :  { %4790 = vmatprep.subr.mxu0 %v4374_v11 }
0x17f9   :  { %v3572_v15 = vpop.permute.xlu0 %3571 }
0x17fa   :  { %4798 = vmatmul.mubr.msk.f32.vlgmr.msra.gmra.mxu1 %vm253_vm2, %v3572_v15  ;;  %v4417_v15 = vld [vmem:[%s5781_s11 + $0x38] sm:$0xff] }
0x17fb   :  { %4807 = vmatprep.mubr.msk.f32.mxu1 %vm5049_vm1, %v5048_v41 }
0x17ff   :  { %v4938_v16 = vpop.eup %4937 }
0x1800   :  { %v3334_v17 = vmul.f32 %v4938_v16, %v4934_v6  ;;  %v4416_v16 = vld [vmem:[%s5781_s11 + $0x30] sm:$0xff] }
0x1802   :  { %4783 = vmatmul.mubr.msk.f32.vlgmr.msra.gmra.mxu0 %vm253_vm2, %v3334_v17  ;;  %v4415_v17 = vld [vmem:[%s5781_s11 + $0x28] sm:$0xff] }
0x1803   :  { %4791 = vmatpush3.msra.mxu0 %v4374_v11  ;;  %v4428_v11 = vld [vmem:[%s5783_s13 + $0x70] sm:$0xff] }
0x1804   :  { %4800 = vmatprep.subr.mxu0 %v5048_v41 }
0x182a   :  { %v3484_v18 = vpop.f32.mrf.mxu1 }
0x182c   :  { %v4789_v19 = vpop.f32.mrf.mxu1 }
0x182d   :  { %v4429_v19 = vld [vmem:[%s5783_s13 + $0x78] sm:$0xff] }
0x18ba   :  { %v3645_v21 = vpop.f32.mrf.mxu1 }
0x18bb   :  { %v3727_v13 = vmul.f32 0.35355338, %v3645_v21  ;;  %v4427_v21 = vld [vmem:[%s5783_s13 + $0x68] sm:$0xff] }
0x18bc   :  { %v4799_v23 = vpop.f32.mrf.mxu1 }
0x18bd   :  { %v3729_v24 = vadd.f32 %v3727_v13, %v5231_v59  ;;  %v4426_v13 = vld [vmem:[%s5783_s13 + $0x60] sm:$0xff] }
0x18bf   :  { %v3731_v25 = vsel %vm253_vm2, %v3729_v24, -inf }
0x18c0   :  { %3732 = vmax.xlane.f32.xlu0 %v3731_v25 }
0x18c2   :  { %v3408_v27 = vpop.f32.mrf.mxu0 }
0x18c3   :  { %4792 = vmatprep.mubr.msk.f32.mxu0 %vm253_vm2, %v3408_v27 }
0x18c4   :  { %v4784_v44 = vpop.f32.mrf.mxu0  ;;  %4793 = vmatmul.mubr.msk.f32.vlgmr.msra.gmra.mxu0 %vm253_vm2, %v3484_v18  ;;  %v4414_v18 = vld [vmem:[%s5781_s11 + $0x20] sm:$0xff] }
0x18c5   :  { %4801 = vmatpush3.xpose.msk.msra.mxu0 %vm253_vm2, %v3652_v26  ;;  %4802 = vmatprep.mubr.msk.f32.mxu0 %vm5049_vm1, %v5048_v41 }
0x18c6   :  { %4810 = vmatprep.subr.mxu0 %v5048_v41 }
0x18c8   :  { %4803 = vmatmul.mubr.msk.f32.vlgmr.msra.gmra.mxu0 %vm253_vm2, %v3650_v28 }
0x18c9   :  { %4812 = vmatprep.mubr.msk.f32.mxu0 %vm5049_vm1, %v5048_v41 }
0x1949   :  { %v3733_v59 = vpop.xlane.xlu0 %3732 }
0x194a   :  { %v3737_v29 = vsub.f32 %v3729_v24, %v3733_v59 }
0x194c   :  { %v3739_v30 = vmul.f32 1.442695, %v3737_v29 }
0x194e   :  { %4939 = vpow2.f32 %v3739_v30 }
0x195b   :  { %v4940_v46 = vpop.eup %4939 }
0x195c   :  { %v3743_v31 = vsel %vm253_vm2, %v4940_v46, 0.0 }
0x195d   :  { %3744 = vadd.xlane.f32.xlu0 %v3743_v31 }
0x1984   :  { %v4794_v33 = vpop.f32.mrf.mxu0 }
0x1985   :  { %v3570_v35 = vadd.f32 %v4794_v33, %v3151_v32 }
0x1986   :  { %v3560_v36 = vpop.f32.mrf.mxu0 }
0x1987   :  { %v3569_v42 = vadd.f32 %v3560_v36, %v3146_v34  ;;  %v4412_v36 = vld [vmem:[%s5779_s9 + $0x1] ss:$0 sm:$0xff] }
0x1988   :  { %v3723_v47 = vpop.f32.mrf.mxu0 }
0x1989   :  { %v3728_v41 = vmul.f32 0.35355338, %v3723_v47 }
0x198a   :  { %v4804_v48 = vpop.f32.mrf.mxu0 }
0x198b   :  { %v3730_v40 = vadd.f32 %v3728_v41, %v5229_v56  ;;  %v4413_v48 = vld [vmem:[%s5780_s10 + $0x1] ss:$0 sm:$0xff] }
0x198d   :  { %v3734_v43 = vsel %vm253_vm2, %v3730_v40, -inf }
0x198e   :  { %3735 = vmax.xlane.f32.xlu1 %v3734_v43 }
0x199f   :  { %3829 = vrot.lane.b32.xlu1 %v5505_v20, %s5802_s22 }
0x19e6   :  { %v3745_v56 = vpop.xlane.xlu0 %3744 }
0x1a17   :  { %v3736_v4 = vpop.xlane.xlu1 %3735 }
0x1a18   :  { %v3738_v38 = vsub.f32 %v3730_v40, %v3736_v4 }
0x1a1a   :  { %v3741_v49 = vmul.f32 1.442695, %v3738_v38 }
0x1a1b   :  { %v3830_v3 = vpop.permute.xlu1 %3829 }
0x1a1c   :  { %4941 = vpow2.f32 %v3741_v49  ;;  %4811 = vmatpush3.msra.mxu0 %v3830_v3  ;;  %v4425_v3 = vld [vmem:[%s5783_s13 + $0x58] sm:$0xff] }
0x1a1d   :  { %4943 = vrcp.f32 %v3745_v56  ;;  %4820 = vmatprep.subr.mxu0 %v4417_v15  ;;  %v4422_v56 = vld [vmem:[%s5783_s13 + $0x40] sm:$0xff] }
0x1a29   :  { %v4942_v45 = vpop.eup %4941 }
0x1a2a   :  { %v3746_v50 = vsel %vm253_vm2, %v4942_v45, 0.0  ;;  %v4944_v52 = vpop.eup %4943 }
0x1a2b   :  { %3747 = vadd.xlane.f32.xlu0 %v3746_v50  ;;  %v3751_v20 = vmul.f32 %v4944_v52, %v4940_v46  ;;  %v4423_v50 = vld [vmem:[%s5783_s13 + $0x48] sm:$0xff] }
0x1a41   :  { %3753 = vrot.lane.b32.xlu0 %v5507_v22, %s5802_s22 }
0x1ab4   :  { %v3748_v51 = vpop.xlane.xlu0 %3747 }
0x1ab5   :  { %4945 = vrcp.f32 %v3748_v51  ;;  %v4419_v51 = vld [vmem:[%s5782_s12 + $0x1] ss:$0 sm:$0xff] }
0x1ab8   :  { %v3754_v53 = vpop.permute.xlu0 %3753 }
0x1ab9   :  { %4806 = vmatpush3.msra.mxu1 %v3754_v53 }
0x1aba   :  { %4808 = vmatmul.mubr.msk.f32.vlgmr.msra.gmra.mxu1 %vm253_vm2, %v3751_v20  ;;  %4815 = vmatprep.subr.mxu1 %v4375_v57 }
0x1abb   :  { %4816 = vmatpush3.msra.mxu1 %v4375_v57 }
0x1abc   :  { %4831 = vmatprep.subr.mxu1 %v4429_v19 }
0x1ac2   :  { %v4946_v54 = vpop.eup %4945 }
0x1ac3   :  { %v3752_v55 = vmul.f32 %v4946_v54, %v4942_v45  ;;  %v4424_v45 = vld [vmem:[%s5783_s13 + $0x50] sm:$0xff] }
0x1ac5   :  { %4813 = vmatmul.mubr.msk.f32.vlgmr.msra.gmra.mxu0 %vm253_vm2, %v3752_v55 }
0x1ac6   :  { %4821 = vmatpush3.msra.mxu0 %v4417_v15 }
0x1ac7   :  { %4822 = vmatprep.subr.mxu0 %v4416_v16 }
0x1ac8   :  { %4823 = vmatpush3.msra.mxu0 %v4416_v16 }
0x1ac9   :  { %4824 = vmatprep.subr.mxu0 %v4415_v17 }
0x1aca   :  { %4825 = vmatpush3.msra.mxu0 %v4415_v17 }
0x1acb   :  { %4826 = vmatprep.subr.mxu0 %v4414_v18 }
0x1acc   :  { %4827 = vmatpush3.msra.mxu0 %v4414_v18 }
0x1b7a   :  { %v3825_v22 = vpop.f32.mrf.mxu1 }
0x1b7b   :  { %4817 = vmatprep.mubr.msk.f32.mxu1 %vm253_vm2, %v3825_v22  ;;  %v4431_v22 = vld [vmem:[%s5784_s14 + $0x1] ss:$0 sm:$0xff] }
0x1b7c   :  { %v4809_v58 = vpop.f32.mrf.mxu1 }
0x1b85   :  { %v3901_v60 = vpop.f32.mrf.mxu0 }
0x1b86   :  { %4818 = vmatmul.mubr.msk.f32.vlgmr.msra.gmra.mxu1 %vm253_vm2, %v3901_v60 }
0x1b87   :  { %v4814_v61 = vpop.f32.mrf.mxu0  ;;  %4832 = vmatpush3.msra.mxu1 %v4429_v19 }
0x1b88   :  { %4833 = vmatprep.subr.mxu1 %v4428_v11 }
0x1b89   :  { %4834 = vmatpush3.msra.mxu1 %v4428_v11 }
0x1b8a   :  { %4835 = vmatprep.subr.mxu1 %v4427_v21 }
0x1b8b   :  { %4836 = vmatpush3.msra.mxu1 %v4427_v21 }
0x1b8c   :  { %4837 = vmatprep.subr.mxu1 %v4426_v13 }
0x1b8d   :  { %4838 = vmatpush3.msra.mxu1 %v4426_v13 }
0x1b8e   :  { %4839 = vmatprep.subr.mxu1 %v4425_v3 }
0x1b8f   :  { %4840 = vmatpush3.msra.mxu1 %v4425_v3 }
0x1b90   :  { %4841 = vmatprep.subr.mxu1 %v4424_v45 }
0x1b91   :  { %4842 = vmatpush3.msra.mxu1 %v4424_v45 }
0x1b92   :  { %4843 = vmatprep.subr.mxu1 %v4423_v50 }
0x1b93   :  { %4844 = vmatpush3.msra.mxu1 %v4423_v50 }
0x1b94   :  { %4845 = vmatprep.subr.mxu1 %v4422_v56 }
0x1b95   :  { %4846 = vmatpush3.msra.mxu1 %v4422_v56 }
0x1c46   :  { %v4819_v62 = vpop.f32.mrf.mxu1 }
0x1c47   :  { %v3987_v63 = vadd.f32 %v4819_v62, %v3570_v35 }
0x1c48   :  { %v3977_v1 = vpop.f32.mrf.mxu1 }
0x1c49   :  { %v3989_v2 = vadd.f32 %v3987_v63, %v5462_v37  ;;  %v3986_v5 = vadd.f32 %v3977_v1, %v3569_v42 }
0x1c4b   :  { %v5681_v6 = vadd.f32 %v4409_v0, %v3989_v2  ;;  %v3988_v7 = vadd.f32 %v3986_v5, %v5465_v39 }
0x1c4d   :  { %v5684_v8 = vadd.f32 %v4409_v0, %v3988_v7  ;;  %v4007_v9 = vsel %vm107_vm0, %v5681_v6, 0.0  ;;  %v4011_v37 = vmul.f32 %v5681_v6, %v5681_v6 }
0x1c4e   :  { %4008 = vadd.xlane.f32.xlu0 %v4007_v9 }
0x1c4f   :  { %v4004_v10 = vsel %vm107_vm0, %v5684_v8, 0.0  ;;  %v4010_v12 = vmul.f32 %v5684_v8, %v5684_v8  ;;  %v4015_v39 = vsel %vm107_vm0, %v4011_v37, 0.0 }
0x1c50   :  { %4005 = vadd.xlane.f32.xlu1 %v4004_v10 }
0x1c51   :  { %v4012_v14 = vsel %vm107_vm0, %v4010_v12, 0.0 }
0x1c52   :  { %4013 = vadd.xlane.f32.xlu0 %v4012_v14 }
0x1c54   :  { %4016 = vadd.xlane.f32.xlu1 %v4015_v39 }
0x1cd7   :  { %v4009_v23 = vpop.xlane.xlu0 %4008 }
0x1cd8   :  { %v4019_v25 = vmul.f32 0.03125, %v4009_v23 }
0x1cd9   :  { %v4006_v24 = vpop.xlane.xlu1 %4005 }
0x1cda   :  { %v4018_v26 = vmul.f32 0.03125, %v4006_v24  ;;  %v4023_v29 = vmul.f32 %v4019_v25, %v4019_v25  ;;  %v4027_v42 = vsub.f32 %v5681_v6, %v4019_v25  ;;  %v4434_v25 = vld [vmem:[%s5785_s15] ss:$0 sm:$0xff]  ;;  %s5015_s15 = scalar_lea.vmem %s4302_s4, 256 }
0x1cdb   :  { %v4014_v27 = vpop.xlane.xlu0 %4013  ;;  %p5016_p1 = scmp.ne.s32.totalorder %s4302_s4, %s5015_s15  ;;  %p5021_p3 = scmp.lt.s32.totalorder %s5015_s15, %s5015_s15 }
0x1cdc   :  { %v4022_v44 = vmul.f32 %v4018_v26, %v4018_v26  ;;  %v4020_v28 = vmul.f32 0.03125, %v4014_v27  ;;  %v4026_v34 = vsub.f32 %v5684_v8, %v4018_v26 }
0x1cdd   :  { %v4017_v59 = vpop.xlane.xlu1 %4016  ;;  %p5022_p4 = por %p5021_p3, %p5020_p2 }
0x1cde   :  { %v4024_v30 = vsub.f32 %v4020_v28, %v4022_v44  ;;  %v4021_v46 = vmul.f32 0.03125, %v4017_v59  ;;  %v4435_v28 = vld [vmem:[%s5786_s16] ss:$0 sm:$0xff] }
0x1cdf   :  { %p5023_p5 = pnand %p5022_p4, %p5016_p1 }
0x1ce0   :  { %v4028_v31 = vadd.f32 1e-05, %v4024_v30  ;;  %v4025_v32 = vsub.f32 %v4021_v46, %v4023_v29 }
0x1ce2   :  { %4947 = vrsqrt.f32 %v4028_v31  ;;  %v4029_v33 = vadd.f32 1e-05, %v4025_v32 }
0x1ce4   :  { %4949 = vrsqrt.f32 %v4029_v33 }
0x1cef   :  { %v4948_v35 = vpop.eup %4947 }
0x1cf0   :  { %v4032_v47 = vmul.f32 %v4948_v35, %v4026_v34 }
0x1cf1   :  { %v4950_v41 = vpop.eup %4949 }
0x1cf2   :  { %v4033_v40 = vmul.f32 %v4950_v41, %v4027_v42  ;;  %v4040_v43 = vmul.f32 %v4412_v36, %v4032_v47 }
0x1cf4   :  { %v4041_v4 = vmul.f32 %v4412_v36, %v4033_v40  ;;  %v4048_v38 = vadd.f32 %v4413_v48, %v4040_v43 }
0x1cf6   :  { %v4049_v49 = vadd.f32 %v4413_v48, %v4041_v4  ;;  %4828 = vmatprep.mubr.msk.f32.mxu0 %vm107_vm0, %v4048_v38 }
0x1cf8   :  { %4829 = vmatmul.mubr.msk.f32.vlgmr.msra.gmra.mxu0 %vm107_vm0, %v4049_v49 }
0x1db8   :  { %v4830_v52 = vpop.f32.mrf.mxu0 }
0x1db9   :  { %v4141_v53 = vadd.f32 %v4830_v52, %v4419_v51 }
0x1dba   :  { %v4135_v20 = vpop.f32.mrf.mxu0 }
0x1dbb   :  { %v4136_v54 = vadd.f32 %v4419_v51, %v4135_v20  ;;  %v4145_v57 = vmax.f32 %v4141_v53, 0.0 }
0x1dbd   :  { %v4144_v55 = vmax.f32 %v4136_v54, 0.0 }
0x1dbf   :  { %4847 = vmatprep.mubr.msk.f32.mxu1 %vm2093_vm3, %v4144_v55 }
0x1dc0   :  { %4848 = vmatmul.mubr.msk.f32.vlgmr.msra.gmra.mxu1 %vm2093_vm3, %v4145_v57 }
0x1e80   :  { %v4849_v58 = vpop.f32.mrf.mxu1 }
0x1e81   :  { %v4241_v60 = vadd.f32 %v4849_v58, %v4431_v22 }
0x1e82   :  { %v4235_v61 = vpop.f32.mrf.mxu1 }
0x1e83   :  { %v4245_v62 = vadd.f32 %v4241_v60, %v5681_v6  ;;  %v4236_v63 = vadd.f32 %v4431_v22, %v4235_v61 }
0x1e85   :  { %v4244_v0 = vadd.f32 %v4236_v63, %v5684_v8  ;;  %v4251_v1 = vsel %vm107_vm0, %v4245_v62, 0.0  ;;  %v4255_v2 = vmul.f32 %v4245_v62, %v4245_v62 }
0x1e86   :  { %4252 = vadd.xlane.f32.xlu1 %v4251_v1 }
0x1e87   :  { %v4248_v5 = vsel %vm107_vm0, %v4244_v0, 0.0  ;;  %v4254_v7 = vmul.f32 %v4244_v0, %v4244_v0  ;;  %v4259_v9 = vsel %vm107_vm0, %v4255_v2, 0.0 }
0x1e88   :  { %4249 = vadd.xlane.f32.xlu0 %v4248_v5 }
0x1e89   :  { %v4256_v10 = vsel %vm107_vm0, %v4254_v7, 0.0 }
0x1e8a   :  { %4260 = vadd.xlane.f32.xlu1 %v4259_v9 }
0x1e8c   :  { %4257 = vadd.xlane.f32.xlu0 %v4256_v10 }
0x1f0f   :  { %v4253_v12 = vpop.xlane.xlu1 %4252 }
0x1f10   :  { %v4263_v37 = vmul.f32 0.03125, %v4253_v12 }
0x1f11   :  { %v4250_v6 = vpop.xlane.xlu0 %4249 }
0x1f12   :  { %v4262_v14 = vmul.f32 0.03125, %v4250_v6  ;;  %v4267_v8 = vmul.f32 %v4263_v37, %v4263_v37  ;;  %v4271_v23 = vsub.f32 %v4245_v62, %v4263_v37 }
0x1f13   :  { %v4261_v39 = vpop.xlane.xlu1 %4260 }
0x1f14   :  { %v4265_v15 = vmul.f32 0.03125, %v4261_v39  ;;  %v4266_v17 = vmul.f32 %v4262_v14, %v4262_v14  ;;  %v4270_v26 = vsub.f32 %v4244_v0, %v4262_v14 }
0x1f15   :  { %v4258_v16 = vpop.xlane.xlu0 %4257 }
0x1f16   :  { %v4269_v18 = vsub.f32 %v4265_v15, %v4267_v8  ;;  %v4264_v19 = vmul.f32 0.03125, %v4258_v16 }
0x1f18   :  { %v4273_v11 = vadd.f32 1e-05, %v4269_v18  ;;  %v4268_v21 = vsub.f32 %v4264_v19, %v4266_v17 }
0x1f1a   :  { %4951 = vrsqrt.f32 %v4273_v11  ;;  %v4272_v13 = vadd.f32 1e-05, %v4268_v21 }
0x1f1c   :  { %4953 = vrsqrt.f32 %v4272_v13 }
0x1f27   :  { %v4952_v24 = vpop.eup %4951 }
0x1f28   :  { %v4277_v27 = vmul.f32 %v4952_v24, %v4271_v23 }
0x1f29   :  { %v4954_v44 = vpop.eup %4953 }
0x1f2a   :  { %v4276_v59 = vmul.f32 %v4954_v44, %v4270_v26  ;;  %v4285_v29 = vmul.f32 %v4434_v25, %v4277_v27 }
0x1f2c   :  { %v4284_v30 = vmul.f32 %v4434_v25, %v4276_v59  ;;  %v4293_v46 = vadd.f32 %v4435_v28, %v4285_v29 }
0x1f2e   :  { %v4292_v31 = vadd.f32 %v4435_v28, %v4284_v30  ;;  %4295 = vst.msk [vmem:[#allocation8 + $0x8] sm:$0xff] %vm107_vm0, %v4293_v46 }
0x1f30   :  { %4294 = vst.msk [vmem:[#allocation8] sm:$0xff] %vm107_vm0, %v4292_v31 }
0x1f31   :  { %5026 = shalt.err (!%p5023_p5)
}
0x1f32   :  { %s5803_s16 = smov 8   ;;  %s5804_s6 = smov 128  }
0x1f33   :  { %4307 = dma.vmem_to_hbm [thread:$0]  %s4302_s4, 256, %s5787_s17, [#allocation4], %s5804_s6, %s5804_s6, %s5803_s16  }
0x1f34   :  { %5039 = dma.done.wait [#allocation4], 256  }
0x1f35   :  { %5040 = vsyncadd [#allocation4], 4294967040 }
0x1f36   :  { %4311 = vsyncpa [#allocation3], 1 }
0x1f37   :  { %4312 = vsyncpa [#allocation6], 1 }
0x1f38   :  { %4313 = vsyncpa [#allocation4], 1 }

</bundles_post_ra>
